<compile_context>
chip_gen: v6e
topology: v6e:2x2x1
jax: 0.10.0
libtpu: 0.0.40
codegen_flags: <defaults>
</compile_context>

<pallas_src>
import jax
import jax.numpy as jnp
from jax.experimental import pallas as pl
from jax.experimental.pallas import tpu as pltpu


NODE_ALIGN = 512   # node-count padding (multiple of the aggregation K tile)
TK_AGG = 512       # aggregation K tile; >=256 for the v6e/v7x 256-wide MXU


def _round_up(x, m):
    return ((x + m - 1) // m) * m


def _pick_tile(dim, candidates):
    for c in candidates:
        if dim % c == 0:
            return c
    return dim  # safety net; all relevant dims are padded to 128/512 multiples


# ---------------------------------------------------------------------------
# Kernel 1: fused per-destination "project + edge-type sum + BN + ReLU".
#
#   out = relu( bias + sum_k  A[:, k-block] @ ( X_all[src_rows(k)] @ W[et(k)] ) )
#
# grid = (M//tm, N//tn, K//tk); K innermost ('arbitrary') walks the columns of
# the per-destination concatenated adjacency.  Two scalar-prefetched SMEM maps
# drive the data-dependent index_maps: srb[k] = row block of X_all holding the
# source nodes of k's edge type, eti[k] = index into the stacked folded weights.
# The small (tk, C_in) @ (C_in, tn) projection is recomputed per (i, j) tile;
# with tm up to 2048 and C_hid <= 512 that redundancy is usually zero and the
# projected features never touch HBM at all.
# ---------------------------------------------------------------------------

def _fused_agg_kernel(srb_ref, eti_ref, a_ref, x_ref, w_ref, b_ref, o_ref,
                      acc_ref):
    del srb_ref, eti_ref  # only used inside the index_maps
    k = pl.program_id(2)

    # projection of this source block with this edge type's (BN-folded) weight
    xw = jnp.dot(x_ref[...], w_ref[0],
                 preferred_element_type=jnp.float32).astype(jnp.bfloat16)
    # aggregation: int8 adjacency multiplicities upcast to bf16 on the VPU,
    # so the MXU always sees bf16 operands (valid on v5e/v6e/v7x).
    part = jnp.dot(a_ref[...].astype(jnp.bfloat16), xw,
                   preferred_element_type=jnp.float32)

    @pl.when(k == 0)
    def _():
        acc_ref[...] = part          # direct write: no zero store + RMW

    @pl.when(k > 0)
    def _():
        acc_ref[...] += part

    @pl.when(k == pl.num_programs(2) - 1)
    def _():
        y = acc_ref[...] + b_ref[...]                       # folded BN bias
        o_ref[...] = jnp.maximum(y, 0.0).astype(o_ref.dtype)  # ReLU epilogue


def fused_aggregate(adj_cat, x_all, w_stack, bias, src_blk, et_idx,
                    *, out_dtype=jnp.bfloat16):
    """relu(bias + sum over edge types of A_et @ (X_src_et @ W_et)).

    adj_cat: (M, K) int8, column blocks ordered by incoming edge type.
    x_all:   (R, Cin) bf16 global feature slab (all node types, fixed offsets).
    w_stack: (n_et, Cin, N) bf16 folded weights, same edge-type order.
    bias:    (1, N) f32 folded-BN bias.
    src_blk: (K//TK_AGG,) int32 — row block of x_all for each k step.
    et_idx:  (K//TK_AGG,) int32 — weight index for each k step.
    """
    M, K = adj_cat.shape
    R, cin = x_all.shape
    n_et, cin2, N = w_stack.shape
    assert cin == cin2 and bias.shape == (1, N)
    assert K % TK_AGG == 0 and R % TK_AGG == 0
    nk = K // TK_AGG
    assert src_blk.shape == (nk,) and et_idx.shape == (nk,)

    tm = _pick_tile(M, (2048, 1024, 512, 256, 128))
    tn = _pick_tile(N, (512, 256, 128))
    tk = TK_AGG
    grid = (M // tm, N // tn, nk)
    n_steps = grid[0] * grid[1] * grid[2]

    a_map = lambda i, j, k, srb, eti: (i, k)
    # 3-deep buffering on the dominant (adjacency) stream hides DMA bubbles at
    # the short k steps; keep the default 2 when the grid is too small.
    try:
        a_spec = (pl.BlockSpec((tm, tk), a_map, pipeline_mode=pl.Buffered(3))
                  if n_steps >= 3 else pl.BlockSpec((tm, tk), a_map))
    except TypeError:  # older BlockSpec without pipeline_mode
        a_spec = pl.BlockSpec((tm, tk), a_map)

    cost = pl.CostEstimate(
        flops=2 * M * N * K + 2 * grid[0] * grid[1] * K * cin * tn,
        transcendentals=0,
        bytes_accessed=(M * K                                  # int8 adjacency
                        + grid[0] * grid[1] * K * cin * 2      # feature blocks
                        + n_et * cin * N * 2 + M * N * 2 + N * 4),
    )
    return pl.pallas_call(
        _fused_agg_kernel,
        out_shape=jax.ShapeDtypeStruct((M, N), out_dtype),
        grid_spec=pltpu.PrefetchScalarGridSpec(
            num_scalar_prefetch=2,
            grid=grid,
            in_specs=[
                a_spec,
                pl.BlockSpec((tk, cin), lambda i, j, k, srb, eti: (srb[k], 0)),
                pl.BlockSpec((1, cin, tn),
                             lambda i, j, k, srb, eti: (eti[k], 0, j)),
                pl.BlockSpec((1, tn), lambda i, j, k, srb, eti: (0, j)),
            ],
            out_specs=pl.BlockSpec((tm, tn), lambda i, j, k, srb, eti: (i, j)),
            scratch_shapes=[pltpu.VMEM((tm, tn), jnp.float32)],
        ),
        compiler_params=pltpu.CompilerParams(
            dimension_semantics=("parallel", "parallel", "arbitrary"),
            vmem_limit_bytes=32 * 1024 * 1024,   # footprint ~<=12 MiB; v7x-safe
        ),
        cost_estimate=cost,
    )(src_blk, et_idx, adj_cat, x_all, w_stack, bias)


# ---------------------------------------------------------------------------
# Kernel 2: plain matmul + bias (final Linear).  When K fits in one tile the
# kernel has no scratch accumulator and writes dot+bias straight to the output
# (relieves v5e's single store slot); otherwise a K-reduction with the same
# k==0 direct-write pattern is used.
# ---------------------------------------------------------------------------

def _linear_single_k_kernel(x_ref, w_ref, b_ref, o_ref):
    o_ref[...] = (jnp.dot(x_ref[...], w_ref[...],
                          preferred_element_type=jnp.float32)
                  + b_ref[...]).astype(o_ref.dtype)


def _linear_multi_k_kernel(x_ref, w_ref, b_ref, o_ref, acc_ref):
    k = pl.program_id(2)
    part = jnp.dot(x_ref[...], w_ref[...], preferred_element_type=jnp.float32)

    @pl.when(k == 0)
    def _():
        acc_ref[...] = part

    @pl.when(k > 0)
    def _():
        acc_ref[...] += part

    @pl.when(k == pl.num_programs(2) - 1)
    def _():
        o_ref[...] = (acc_ref[...] + b_ref[...]).astype(o_ref.dtype)


def linear_bias(x, w, b, *, out_dtype=jnp.float32):
    """out = x @ w + b. x:(M,K) bf16, w:(K,N) bf16, b:(1,N) f32."""
    M, K = x.shape
    K2, N = w.shape
    assert K == K2 and b.shape == (1, N)
    tm = _pick_tile(M, (1024, 512, 256, 128))
    tn = _pick_tile(N, (512, 256, 128))
    tk = _pick_tile(K, (512, 256, 128))

    if K == tk:   # single K tile: no scratch accumulator needed
        return pl.pallas_call(
            _linear_single_k_kernel,
            out_shape=jax.ShapeDtypeStruct((M, N), out_dtype),
            grid_spec=pltpu.PrefetchScalarGridSpec(
                num_scalar_prefetch=0,
                grid=(M // tm, N // tn),
                in_specs=[pl.BlockSpec((tm, K), lambda i, j: (i, 0)),
                          pl.BlockSpec((K, tn), lambda i, j: (0, j)),
                          pl.BlockSpec((1, tn), lambda i, j: (0, j))],
                out_specs=pl.BlockSpec((tm, tn), lambda i, j: (i, j)),
            ),
            compiler_params=pltpu.CompilerParams(
                dimension_semantics=("parallel", "parallel"),
                vmem_limit_bytes=32 * 1024 * 1024),
        )(x, w, b)

    return pl.pallas_call(
        _linear_multi_k_kernel,
        out_shape=jax.ShapeDtypeStruct((M, N), out_dtype),
        grid_spec=pltpu.PrefetchScalarGridSpec(
            num_scalar_prefetch=0,
            grid=(M // tm, N // tn, K // tk),
            in_specs=[pl.BlockSpec((tm, tk), lambda i, j, k: (i, k)),
                      pl.BlockSpec((tk, tn), lambda i, j, k: (k, j)),
                      pl.BlockSpec((1, tn), lambda i, j, k: (0, j))],
            out_specs=pl.BlockSpec((tm, tn), lambda i, j, k: (i, j)),
            scratch_shapes=[pltpu.VMEM((tm, tn), jnp.float32)],
        ),
        compiler_params=pltpu.CompilerParams(
            dimension_semantics=("parallel", "parallel", "arbitrary"),
            vmem_limit_bytes=32 * 1024 * 1024),
    )(x, w, b)


# ---------------------------------------------------------------------------
# Glue: adjacency construction, parameter setup, orchestration.
# ---------------------------------------------------------------------------

def dense_adjacency_int8(edge_index, n_src_pad, n_dst_pad):
    """A[dst, src] = multiplicity of edge src->dst, stored as int8.

    Built directly as int8 (no f32 intermediate); multiplicities assumed <128.
    """
    row, col = edge_index[0], edge_index[1]
    adj = jnp.zeros((n_dst_pad, n_src_pad), jnp.int8)
    return adj.at[col, row].add(jnp.ones_like(col, jnp.int8))


def glorot(key, shape):
    fan_in, fan_out = shape
    scale = jnp.sqrt(2.0 / (fan_in + fan_out))
    return scale * jax.random.normal(key, shape, dtype=jnp.float32)


class HeteroGNNPallas:
    EPS = 1e-5

    def __init__(self, metadata, in_channels, hidden_channels, out_channels,
                 num_layers=2, node_type=None, seed=0):
        self.node_types, self.edge_types = metadata
        self.node_type = node_type if node_type is not None else self.node_types[0]
        self.num_layers = num_layers
        self.in_channels = in_channels
        self.hidden_channels = hidden_channels
        self.out_channels = out_channels
        self.c_in_pad = _round_up(in_channels, 128)
        self.c_hid_pad = _round_up(hidden_channels, 128)
        self.c_out_pad = _round_up(out_channels, 128)

        key = jax.random.PRNGKey(seed)
        self.conv_w = []   # per layer: {edge_key: (c_in_pad, c_hid_pad) f32}
        self.conv_b = []   # per layer: {edge_key: (c_hid_pad,) f32}
        self.bn = []       # per layer: {node_type: (gamma, beta, mean, var)}
        for i in range(num_layers):
            c_in = in_channels if i == 0 else hidden_channels
            c_in_pad = self.c_in_pad if i == 0 else self.c_hid_pad
            ws, bs = {}, {}
            for et in self.edge_types:
                key, kw = jax.random.split(key)
                w = glorot(kw, (c_in, hidden_channels))
                wp = jnp.zeros((c_in_pad, self.c_hid_pad), jnp.float32)
                wp = wp.at[:c_in, :hidden_channels].set(w)
                k = '__'.join(et)
                ws[k] = wp
                bs[k] = jnp.zeros((self.c_hid_pad,), jnp.float32)
            self.conv_w.append(ws)
            self.conv_b.append(bs)

            bns = {}
            for nt in self.node_types:
                key, kg, kb = jax.random.split(key, 3)
                gamma = jnp.ones((self.c_hid_pad,), jnp.float32).at[:hidden_channels].set(
                    0.5 + jax.random.uniform(kg, (hidden_channels,), dtype=jnp.float32))
                beta = jnp.zeros((self.c_hid_pad,), jnp.float32).at[:hidden_channels].set(
                    0.1 * jax.random.normal(kb, (hidden_channels,), dtype=jnp.float32))
                mean = jnp.zeros((self.c_hid_pad,), jnp.float32)   # fresh running stats
                var = jnp.ones((self.c_hid_pad,), jnp.float32)
                bns[nt] = (gamma, beta, mean, var)
            self.bn.append(bns)

        # Fold eval-mode BatchNorm scale into the conv weights once; padded
        # channels have scale=1 / shift=0 so they stay exactly zero.
        self.bn_scale = []   # per layer: {node_type: (c_hid_pad,) f32}
        self.folded_w = []   # per layer: {edge_key: bf16 (c_in_pad, c_hid_pad)}
        for i in range(num_layers):
            scales = {}
            for nt in self.node_types:
                gamma, _beta, _mean, var = self.bn[i][nt]
                scales[nt] = gamma * jax.lax.rsqrt(var + self.EPS)
            fw = {}
            for et in self.edge_types:
                k = '__'.join(et)
                fw[k] = (self.conv_w[i][k] * scales[et[2]][None, :]).astype(jnp.bfloat16)
            self.bn_scale.append(scales)
            self.folded_w.append(fw)

        key, kw = jax.random.split(key)
        lw = glorot(kw, (hidden_channels, out_channels))
        self.lin_w_f32 = (jnp.zeros((self.c_hid_pad, self.c_out_pad), jnp.float32)
                          .at[:hidden_channels, :out_channels].set(lw))
        self.lin_w = self.lin_w_f32.astype(jnp.bfloat16)
        self.lin_b = jnp.zeros((1, self.c_out_pad), jnp.float32)

    def _agg_bias(self, layer, dst, ets):
        """Folded-BN bias for one destination node type: (sum_et b_et - mean)*scale + beta."""
        _gamma, beta, mean, _var = self.bn[layer][dst]
        scale = self.bn_scale[layer][dst]
        b_sum = sum(self.conv_b[layer]['__'.join(et)] for et in ets)
        return ((b_sum - mean) * scale + beta).reshape(1, -1)

    def forward(self, x_dict, edge_index_dict):
        # ---- node bookkeeping: pad counts to NODE_ALIGN, fixed row offsets ----
        types = [t for t in self.node_types if t in x_dict]
        n_real = {t: x_dict[t].shape[0] for t in types}
        n_pad = {t: _round_up(max(n, 1), NODE_ALIGN) for t, n in n_real.items()}
        row_off, off = {}, 0
        for t in types:
            row_off[t] = off
            off += n_pad[t]
        total_rows = off

        def build_x_all(feat, c_pad):
            """Single global feature slab (all node types stacked, bf16)."""
            buf = jnp.zeros((total_rows, c_pad), jnp.bfloat16)
            for t in types:
                if t in feat:
                    f = feat[t].astype(jnp.bfloat16)
                    buf = buf.at[row_off[t]:row_off[t] + f.shape[0],
                                 :f.shape[1]].set(f)
            return buf

        # ---- per-dst static structure (adjacency + scalar-prefetch maps), once ----
        incoming = {}
        for et in edge_index_dict:
            if '__'.join(et) not in self.conv_w[0]:
                continue
            if et[0] not in n_pad:          # source features missing entirely
                continue
            incoming.setdefault(et[2], []).append(et)
        # TODO(synk): the reference drops node types that never appear as a
        # destination after layer 1 (and would KeyError if they are later used
        # as a source); here such sources simply contribute zeros in layers>=1.

        adj_cat, src_blk, et_idx = {}, {}, {}
        for dst, ets in incoming.items():
            blocks, sb, ei = [], [], []
            for e_i, et in enumerate(ets):
                src = et[0]
                blocks.append(dense_adjacency_int8(
                    edge_index_dict[et], n_pad[src], n_pad[dst]))
                nblk = n_pad[src] // TK_AGG
                sb += [row_off[src] // TK_AGG + b for b in range(nblk)]
                ei += [e_i] * nblk
            adj_cat[dst] = jnp.concatenate(blocks, axis=1)
            src_blk[dst] = jnp.asarray(sb, jnp.int32)
            et_idx[dst] = jnp.asarray(ei, jnp.int32)

        # ---- layers: one fused pallas_call per (layer, dst) ----
        x_all = build_x_all(x_dict, self.c_in_pad)
        cur = None
        for i in range(self.num_layers):
            new = {}
            for dst, ets in incoming.items():
                w_stack = jnp.stack(
                    [self.folded_w[i]['__'.join(et)] for et in ets], axis=0)
                bias = self._agg_bias(i, dst, ets)
                new[dst] = fused_aggregate(adj_cat[dst], x_all, w_stack, bias,
                                           src_blk[dst], et_idx[dst])
            cur = new
            if i + 1 < self.num_layers:
                x_all = build_x_all(cur, self.c_hid_pad)

        if cur is None or self.node_type not in cur:
            raise ValueError(f"node type {self.node_type!r} has no incoming edges")

        x = cur[self.node_type]                               # jumping_knowledge 'last'
        out = linear_bias(x, self.lin_w, self.lin_b, out_dtype=jnp.float32)
        return out[:n_real[self.node_type], :self.out_channels]


# ---------------------------------------------------------------------------
# Pure-JAX f32 reference (un-padded, un-folded) for a tolerance check.
# ---------------------------------------------------------------------------

def reference_forward(model, x_dict, edge_index_dict):
    H, O = model.hidden_channels, model.out_channels
    n_real = {t: v.shape[0] for t, v in x_dict.items()}
    x = {t: v.astype(jnp.float32) for t, v in x_dict.items()}
    for i in range(model.num_layers):
        c_in = model.in_channels if i == 0 else H
        out = {}
        for et, ei in edge_index_dict.items():
            key = '__'.join(et)
            if key not in model.conv_w[i]:
                continue
            src, _rel, dst = et
            if src not in x:
                continue
            W = model.conv_w[i][key][:c_in, :H]
            b = model.conv_b[i][key][:H]
            A = (jnp.zeros((n_real[dst], n_real[src]), jnp.float32)
                 .at[ei[1], ei[0]].add(1.0))
            contrib = A @ (x[src] @ W) + b
            out[dst] = contrib if dst not in out else out[dst] + contrib
        new_x = {}
        for dst, v in out.items():
            gamma, beta, mean, var = model.bn[i][dst]
            v = ((v - mean[:H]) * gamma[:H] * jax.lax.rsqrt(var[:H] + model.EPS)
                 + beta[:H])
            new_x[dst] = jnp.maximum(v, 0.0)
        x = new_x
    feat = x[model.node_type]
    return feat @ model.lin_w_f32[:H, :O] + model.lin_b[0, :O]


# ---------------------------------------------------------------------------
# Example run
# ---------------------------------------------------------------------------

if __name__ == "__main__":
    key = jax.random.PRNGKey(0)

    node_types = ['paper', 'author']
    edge_types = [('paper', 'cites', 'paper'),
                  ('author', 'writes', 'paper'),
                  ('paper', 'rev_writes', 'author')]
    metadata = (node_types, edge_types)

    n_paper, n_author = 16, 16
    in_channels, hidden_channels, out_channels = 16, 32, 8
    num_edges = 32

    key, k1, k2 = jax.random.split(key, 3)
    x_dict = {
        'paper': jax.random.normal(k1, (n_paper, in_channels), dtype=jnp.float32),
        'author': jax.random.normal(k2, (n_author, in_channels), dtype=jnp.float32),
    }
    n_of = {'paper': n_paper, 'author': n_author}
    edge_index_dict = {}
    for et in edge_types:
        src, _rel, dst = et
        key, ks, kd = jax.random.split(key, 3)
        rows = jax.random.randint(ks, (num_edges,), 0, n_of[src], dtype=jnp.int32)
        cols = jax.random.randint(kd, (num_edges,), 0, n_of[dst], dtype=jnp.int32)
        edge_index_dict[et] = jnp.stack([rows, cols], axis=0)

    model = HeteroGNNPallas(metadata, in_channels, hidden_channels, out_channels,
                            num_layers=2, node_type='paper', seed=0)

    out = model.forward(x_dict, edge_index_dict)
    out = jax.block_until_ready(out)
    assert out.shape == (n_paper, out_channels)
    assert bool(jnp.all(jnp.isfinite(out)))

    # Tolerance check vs. the pure-JAX f32 reference (kernel computes with
    # bf16 MXU operands / f32 accumulation, so allow a few percent).
    ref = jax.block_until_ready(reference_forward(model, x_dict, edge_index_dict))
    max_err = float(jnp.max(jnp.abs(out - ref)))
    ref_scale = float(jnp.max(jnp.abs(ref))) + 1e-6
    assert max_err <= 0.05 * ref_scale + 0.1, (
        f"kernel/reference mismatch: max_err={max_err:.4f}, ref_scale={ref_scale:.4f}")

    print("KERNEL_OK")
</pallas_src>

<mosaic_0001>
module attributes {stable_mosaic.version = 11 : i64} {
  func.func @_fused_agg_kernel(%arg0: i32, %arg1: i32, %arg2: i32, %arg3: memref<2xi32, #tpu.memory_space<smem>>, %arg4: memref<2xi32, #tpu.memory_space<smem>>, %arg5: memref<512x512xi8, #tpu.memory_space<vmem>>, %arg6: memref<512x128xbf16, #tpu.memory_space<vmem>>, %arg7: memref<1x128x128xbf16, #tpu.memory_space<vmem>>, %arg8: memref<1x128xf32, #tpu.memory_space<vmem>>, %arg9: memref<512x128xbf16, #tpu.memory_space<vmem>>, %arg10: memref<512x128xf32, #tpu.memory_space<vmem>>) attributes {dimension_semantics = [#tpu.dimension_semantics<parallel>, #tpu.dimension_semantics<parallel>, #tpu.dimension_semantics<arbitrary>], iteration_bounds = array<i64: 1, 1, 2>, scalar_prefetch = 2 : i64, scratch_operands = 1 : i64, tpu.core_type = #tpu.core_type<tc>, window_params = [{transform_indices = @transform_0, window_bounds = array<i64: 512, 512>}, {transform_indices = @transform_1, window_bounds = array<i64: 512, 128>}, {transform_indices = @transform_2, window_bounds = array<i64: 1, 128, 128>}, {transform_indices = @transform_3, window_bounds = array<i64: 1, 128>}, {transform_indices = @transform_4, window_bounds = array<i64: 512, 128>}]} {
    %c0 = arith.constant 0 : index
    %c0_0 = arith.constant 0 : index
    %0 = vector.load %arg6[%c0, %c0_0] : memref<512x128xbf16, #tpu.memory_space<vmem>>, vector<512x128xbf16>
    %c0_1 = arith.constant 0 : index
    %c0_2 = arith.constant 0 : index
    %c0_3 = arith.constant 0 : index
    %1 = vector.load %arg7[%c0_1, %c0_2, %c0_3] : memref<1x128x128xbf16, #tpu.memory_space<vmem>>, vector<1x128x128xbf16>
    %2 = vector.shape_cast %1 : vector<1x128x128xbf16> to vector<128x128xbf16>
    %cst = arith.constant dense<0.000000e+00> : vector<512x128xf32>
    %3 = tpu.matmul %0, %2, %cst {dimension_numbers = #tpu.dot_dimension_numbers<[1], [0], [0], [1], [0, 0, 1, 1], [], []>} : vector<512x128xbf16>, vector<128x128xbf16>, vector<512x128xf32> -> vector<512x128xf32>
    %4 = arith.truncf %3 : vector<512x128xf32> to vector<512x128xbf16>
    %c0_4 = arith.constant 0 : index
    %c0_5 = arith.constant 0 : index
    %5 = vector.load %arg5[%c0_4, %c0_5] : memref<512x512xi8, #tpu.memory_space<vmem>>, vector<512x512xi8>
    %6 = arith.sitofp %5 : vector<512x512xi8> to vector<512x512xbf16>
    %cst_6 = arith.constant dense<0.000000e+00> : vector<512x128xf32>
    %7 = tpu.matmul %6, %4, %cst_6 {dimension_numbers = #tpu.dot_dimension_numbers<[1], [0], [0], [1], [0, 0, 1, 1], [], []>} : vector<512x512xbf16>, vector<512x128xbf16>, vector<512x128xf32> -> vector<512x128xf32>
    %c0_i32 = arith.constant 0 : i32
    %8 = arith.cmpi eq, %arg2, %c0_i32 : i32
    %9 = arith.extui %8 : i1 to i32
    %c0_i32_7 = arith.constant 0 : i32
    %10 = arith.cmpi ne, %9, %c0_i32_7 : i32
    scf.if %10 {
      %c0_11 = arith.constant 0 : index
      %c0_12 = arith.constant 0 : index
      %17 = vector.load %arg10[%c0_11, %c0_12] : memref<512x128xf32, #tpu.memory_space<vmem>>, vector<512x128xf32>
      tpu.vector_store %arg10[%c0_11, %c0_12], %7 {strides = array<i32>} : memref<512x128xf32, #tpu.memory_space<vmem>>, vector<512x128xf32>,
    } else {
    }
    %c0_i32_8 = arith.constant 0 : i32
    %11 = arith.cmpi sgt, %arg2, %c0_i32_8 : i32
    %12 = arith.extui %11 : i1 to i32
    %c0_i32_9 = arith.constant 0 : i32
    %13 = arith.cmpi ne, %12, %c0_i32_9 : i32
    scf.if %13 {
      %c0_11 = arith.constant 0 : index
      %c0_12 = arith.constant 0 : index
      %17 = vector.load %arg10[%c0_11, %c0_12] : memref<512x128xf32, #tpu.memory_space<vmem>>, vector<512x128xf32>
      %18 = arith.addf %17, %7 : vector<512x128xf32>
      %c0_13 = arith.constant 0 : index
      %c0_14 = arith.constant 0 : index
      %19 = vector.load %arg10[%c0_13, %c0_14] : memref<512x128xf32, #tpu.memory_space<vmem>>, vector<512x128xf32>
      tpu.vector_store %arg10[%c0_13, %c0_14], %18 {strides = array<i32>} : memref<512x128xf32, #tpu.memory_space<vmem>>, vector<512x128xf32>,
    } else {
    }
    %c1_i32 = arith.constant 1 : i32
    %14 = arith.cmpi eq, %arg2, %c1_i32 : i32
    %15 = arith.extui %14 : i1 to i32
    %c0_i32_10 = arith.constant 0 : i32
    %16 = arith.cmpi ne, %15, %c0_i32_10 : i32
    scf.if %16 {
      %c0_11 = arith.constant 0 : index
      %c0_12 = arith.constant 0 : index
      %17 = vector.load %arg10[%c0_11, %c0_12] : memref<512x128xf32, #tpu.memory_space<vmem>>, vector<512x128xf32>
      %c0_13 = arith.constant 0 : index
      %c0_14 = arith.constant 0 : index
      %18 = vector.load %arg8[%c0_13, %c0_14] : memref<1x128xf32, #tpu.memory_space<vmem>>, vector<1x128xf32>
      %19 = vector.broadcast %18 : vector<1x128xf32> to vector<512x128xf32>
      %20 = arith.addf %17, %19 : vector<512x128xf32>
      %cst_15 = arith.constant 0.000000e+00 : f32
      %21 = vector.broadcast %cst_15 : f32 to vector<512x128xf32>
      %22 = arith.maximumf %20, %21 : vector<512x128xf32>
      %23 = arith.truncf %22 : vector<512x128xf32> to vector<512x128xbf16>
      %c0_16 = arith.constant 0 : index
      %c0_17 = arith.constant 0 : index
      %24 = vector.load %arg9[%c0_16, %c0_17] : memref<512x128xbf16, #tpu.memory_space<vmem>>, vector<512x128xbf16>
      tpu.vector_store %arg9[%c0_16, %c0_17], %23 {strides = array<i32>} : memref<512x128xbf16, #tpu.memory_space<vmem>>, vector<512x128xbf16>,
    } else {
    }
    return
  }
  func.func @transform_0(%arg0: i32, %arg1: i32, %arg2: i32, %arg3: memref<2xi32, #tpu.memory_space<smem>>, %arg4: memref<2xi32, #tpu.memory_space<smem>>) -> (i32, i32) {
    %c0_i32 = arith.constant 0 : i32
    return %arg0, %arg2 : i32, i32
  }
  func.func @transform_1(%arg0: i32, %arg1: i32, %arg2: i32, %arg3: memref<2xi32, #tpu.memory_space<smem>>, %arg4: memref<2xi32, #tpu.memory_space<smem>>) -> (i32, i32) {
    %0 = arith.index_cast %arg2 : i32 to index
    %1 = memref.load %arg3[%0] : memref<2xi32, #tpu.memory_space<smem>>
    %c0_i32 = arith.constant 0 : i32
    %c0_i32_0 = arith.constant 0 : i32
    return %1, %c0_i32 : i32, i32
  }
  func.func @transform_2(%arg0: i32, %arg1: i32, %arg2: i32, %arg3: memref<2xi32, #tpu.memory_space<smem>>, %arg4: memref<2xi32, #tpu.memory_space<smem>>) -> (i32, i32, i32) {
    %0 = arith.index_cast %arg2 : i32 to index
    %1 = memref.load %arg4[%0] : memref<2xi32, #tpu.memory_space<smem>>
    %c0_i32 = arith.constant 0 : i32
    %c0_i32_0 = arith.constant 0 : i32
    return %1, %c0_i32, %arg1 : i32, i32, i32
  }
  func.func @transform_3(%arg0: i32, %arg1: i32, %arg2: i32, %arg3: memref<2xi32, #tpu.memory_space<smem>>, %arg4: memref<2xi32, #tpu.memory_space<smem>>) -> (i32, i32) {
    %c0_i32 = arith.constant 0 : i32
    %c0_i32_0 = arith.constant 0 : i32
    return %c0_i32, %arg1 : i32, i32
  }
  func.func @transform_4(%arg0: i32, %arg1: i32, %arg2: i32, %arg3: memref<2xi32, #tpu.memory_space<smem>>, %arg4: memref<2xi32, #tpu.memory_space<smem>>) -> (i32, i32) {
    %c0_i32 = arith.constant 0 : i32
    return %arg0, %arg1 : i32, i32
  }
}

</mosaic_0001>

<bundles_post_ra>
// kernel: tpu_custom_call.1
= control target key start
LH: loop header
LB: loop body
LE: loop exit
PB: predicated region body
PF: predicated region fallthrough
CT: control target
= control target key end

     0   :  { %s3632_s21 = smov [#allocation4]   ;;  %s4560_s0 = inlined_call_operand.hbm [shape: s32[2], index: 0, kind: input, shape index: {}]   ;;  %s4561_s2 = inlined_call_operand.hbm [shape: s8[512,1024], index: 2, kind: input, shape index: {}]   ;;  %s4562_s3 = inlined_call_operand.hbm [shape: bf16[1024,128], index: 3, kind: input, shape index: {}]   ;;  %s4563_s4 = inlined_call_operand.hbm [shape: bf16[2,128,128], index: 4, kind: input, shape index: {}]   ;;  %s4564_s5 = inlined_call_operand.vmem [shape: f32[1,128], index: 5, kind: input, shape index: {}]   ;;  %s4565_s6 = inlined_call_operand.hbm [shape: bf16[512,128], index: 6, kind: output, shape index: {}]   ;;  %s4566_s1 = inlined_call_operand.vmem [shape: s32[2], index: 1, kind: input, shape index: {}]  }
   0x1   :  { %4577 = sst [smem:[#allocation39_spill]] %s4561_s2  ;;  %s13_s26 = sshll.u32 %s4566_s1, 4  ;;  %s14_s26 = int_to_ptr.vmem [resolvable:$true] %s13_s26 }
   0x2   :  { %4578 = sst [smem:[#allocation40_spill]] %s4562_s3  ;;  %s3398_s27 = scalar_lea.vmem %s14_s26, 16 }
   0x3   :  { %4579 = sst [smem:[#allocation41_spill]] %s4564_s5  ;;  %p3399_p0 = scmp.ne.s32.totalorder %s14_s26, %s3398_s27 }
   0x4   :  { %4580 = sst [smem:[#allocation42_spill]] %s4565_s6  ;;  %p3403_p1 = scmp.lt.s32.totalorder %s14_s26, %s14_s26 }
   0x5   :  { %12 = dma.hbm_to_smem %s4560_s0, 16, %s3632_s21, [#allocation3] }
   0x6   :  { %p3404_p2 = scmp.lt.s32.totalorder %s3398_s27, %s3398_s27 }
   0x8   :  { %p3405_p3 = por %p3404_p2, %p3403_p1 }
   0xa   :  { %p3406_p4 = pnand %p3405_p3, %p3399_p0 }
   0xc   :  { %3409 = shalt.err (!%p3406_p4)  }
   0xd   :  { %s3633_s28 = smov [#allocation5]  }
   0xe   :  { %16 = dma.vmem_to_smem %s14_s26, 16, %s3633_s28, [#allocation3] }
   0xf   :  { %3566 = dma.done.wait [#allocation3], 32 }
  0x10   :  { %3567 = vsyncadd [#allocation3], 4294967264 }
  0x11   :  { %18 = sfence }
  0x12   :  { %19 = vsyncpa [#allocation7], 0 }
  0x13   :  { %21 = vsyncpa [#allocation7 + $0x1], 0 }
  0x14   :  { %22 = vsyncpa [#allocation10], 0 }
  0x15   :  { %24 = vsyncpa [#allocation10 + $0x1], 0 }
  0x16   :  { %25 = vsyncpa [#allocation8], 0  ;;  %s3687_s0 = smov 0   ;;  %s3689_s1 = smov 0  }
  0x17   :  { %s3691_s29 = smov 0   ;;  %s3693_s30 = smov 0  }
  0x18   :  { %s3695_s7 = smov 0   ;;  %s3697_s8 = smov 0  }
  0x19   :  { %s3699_s9 = smov 0   ;;  %s3701_s10 = smov 0  }
  0x1a   :  { %s3703_s11 = smov 0   ;;  %s3705_s12 = smov 0  }
  0x1b   :  { %s3707_s13 = smov 0   ;;  %s3709_s14 = smov 0  }
  0x1c LB: > { %4581 = sst [smem:[#allocation22_spill]] %s3606_s8  ;;  %s3746_s15 = sadd.s32 4294967295, %s3630_s14   ;;  %s3630_s14 = sphi %s3709_s14, %s31_s14   ;;  %s3626_s13 = sphi %s3707_s13, %s4664_s13   ;;  %s3622_s12 = sphi %s3705_s12, %s4663_s12   ;;  %s3618_s11 = sphi %s3703_s11, %s4662_s11   ;;  %s3614_s10 = sphi %s3701_s10, %s4661_s10   ;;  %s3610_s9 = sphi %s3699_s9, %s4660_s9   ;;  %s3606_s8 = sphi %s3697_s8, %s4654_s8   ;;  %s3602_s7 = sphi %s3695_s7, %s4659_s7   ;;  %s3598_s30 = sphi %s3693_s30, %s4658_s30   ;;  %s3594_s29 = sphi %s3691_s29, %s4657_s29   ;;  %s3590_s1 = sphi %s3689_s1, %s4656_s1   ;;  %s3586_s0 = sphi %s3687_s0, %s4655_s0  }
  0x1d   : > { %s43_s16 = sadd.s32 1, %s3626_s13  ;;  %p4570_p6 = scmp.eq.s32.totalorder %s3630_s14, 0 }
  0x1e   : > { %p44_p5 = scmp.ge.s32.totalorder %s43_s16, 2  ;;  %p4569_p7 = scmp.eq.s32.totalorder %s3746_s15, 0 }
  0x1f   : > { %s82_s17 = sld [smem:[#allocation4 + %s3626_s13]]  ;;  %s87_s18 = sadd.s32 1, %s3606_s8 }
  0x20   : > { %s4666_s16 = smov (%p44_p5, %s43_s16), 0  ;;  %p94_p8 = scmp.ne.s32.totalorder %s3606_s8, %s3602_s7 }
  0x21   : > { %s83_s19 = sld [smem:[#allocation4 + %s4666_s16]]  ;;  %p100_p9 = scmp.ne.s32.totalorder %s3602_s7, %s3598_s30 }
  0x22   : > { %p3761_p10 = por %p94_p8, %p4570_p6  ;;  %p4568_p12 = scmp.lt.s32.totalorder %s3630_s14, 2 }
  0x23   : > { %p3767_p11 = por %p100_p9, %p4569_p7  ;;  %s238_s22 = sand.u32 1, %s3630_s14  }
  0x24   : > { %s240_s23 = sand.u32 1, %s3606_s8   ;;  %p3778_p13 = pnand %p4568_p12, %p3761_p10 }
  0x25   : > { %s4583_s21 = scalar_select %p3767_p11, 1, 0 }
  0x26   : > { %s2696_s24 = sshll.u32 %s240_s23, 8  ;;  %p2702_p1 = scmp.ge.s32.totalorder %s3630_s14, 1 }
  0x27   : > { %s84_s26 = ssub.s32 %s82_s17, %s83_s19  ;;  %s242_s27 = scalar_lea.vmem [#allocation9], %s2696_s24 }
  0x28   : > { %s250_s28 = sshll.u32 %s242_s27, 4  ;;  %p85_p0 = scmp.eq.s32.totalorder %s84_s26, 0  ;;  %s3782_s28 = int_to_ptr.vmem [resolvable:$true] %s250_s28 }
  0x29   : > { %s3213_s30 = scalar_select %p3761_p10, [#allocation4], [#allocation13] }
  0x2a   : > { %s3787_s6 = scalar_select %p85_p0, %s3606_s8, %s87_s18  }
  0x2b   : > { %s3214_s23 = scalar_select %p3761_p10, %s3626_s13, 0 }
  0x2c   : > { %4585 = sst [smem:[#allocation23_spill]] %s3787_s6  ;;  %s4668_s30 = smov (!%p4568_p12, %s3213_s30), [#allocation15] }
  0x2d   : > { %s4670_s23 = smov (!%p4568_p12, %s3214_s23), 0  ;;  %p281_p2 = scmp.lt.s32.totalorder %s3630_s14, 3 }
  0x2e   : > { %s243_s5 = sld [smem:[%s4668_s30 + %s4670_s23]]  ;;  %s55_s18 = ssub.s32 %s3626_s13, %s4666_s16 }
  0x2f   : > { %p3798_p3 = pnand %p2702_p1, %p281_p2  ;;  %s4587_s3 = sld [smem:[#allocation40_spill]] }
  0x30   : > { %s3809_s20 = scalar_lea.sflag [#allocation10], %s238_s22  ;;  %p3412_p5 = pneg %p3778_p13 }
  0x31   : > { %s4586_s17 = scalar_select %p3798_p3, 1, 0 }
  0x34   : > { %s2819_s19 = sshll.u32 %s243_s5, 12 }
  0x35   : > { %s3805_s27 = scalar_lea.hbm %s4587_s3, %s2819_s19  ;;  %s3415_s5 = scalar_lea.hbm %s4587_s3, 8192 }
  0x36   : > { %s3410_s6 = scalar_lea.hbm %s3805_s27, 4096  ;;  %p3416_p10 = scmp.lt.s32.totalorder %s3805_s27, %s4587_s3 }
  0x37   : > { %p3411_p4 = scmp.ne.s32.totalorder %s3805_s27, %s3410_s6  ;;  %p3417_p0 = scmp.lt.s32.totalorder %s3415_s5, %s3410_s6 }
  0x39   : > { %p3413_p8 = pnand %p3412_p5, %p3411_p4  ;;  %p3418_p1 = por %p3417_p0, %p3416_p10 }
  0x3b   : > { %p3414_p9 = pneg %p3413_p8 }
  0x3d   : > { %p3419_p2 = pnand %p3418_p1, %p3414_p9 }
  0x3f   : > { %3422 = shalt.err (!%p3419_p2)
}
  0x40   : > { %s3423_s22 = scalar_lea.vmem %s3782_s28, 4096  ;;  %s3634_s19 = smov [#allocation9]  }
  0x41   : > { %p3424_p12 = scmp.ne.s32.totalorder %s3782_s28, %s3423_s22  ;;  %s3428_s26 = sshll.u32 %s3634_s19, 4  ;;  %s3429_s26 = int_to_ptr.vmem [resolvable:$false] %s3428_s26 }
  0x42   : > { %s3430_s30 = scalar_lea.vmem %s3429_s26, 8192  ;;  %p3431_p8 = scmp.lt.s32.totalorder %s3782_s28, %s3429_s26 }
  0x43   : > { %p3426_p7 = pnand %p3424_p12, %p3412_p5  ;;  %p3432_p6 = scmp.lt.s32.totalorder %s3430_s30, %s3423_s22 }
  0x45   : > { %p3427_p4 = pneg %p3426_p7  ;;  %p3433_p11 = por %p3432_p6, %p3431_p8 }
  0x47   : > { %p3434_p3 = pnand %p3433_p11, %p3427_p4 }
  0x49   : > { %3437 = shalt.err (!%p3434_p3)
}
  0x4a   : > { %s4572_s6 = smov 64   ;;  %s4573_s8 = smov 4  }
  0x4b   : > { %3234 = dma.hbm_to_vmem [thread:$0]  (!%p3778_p13), %s3805_s27, 4096, %s3782_s28, %s3809_s20, %s4572_s6, %s4572_s6, %s4573_s8  }
  0x4c   : > { %p57_p6 = scmp.eq.s32.totalorder %s55_s18, 0  ;;  %s59_s23 = sadd.s32 1, %s3618_s11 }
  0x4d   : > { %p66_p7 = scmp.ne.s32.totalorder %s3618_s11, %s3614_s10  ;;  %p72_p11 = scmp.ne.s32.totalorder %s3614_s10, %s3610_s9 }
  0x4e   : > { %s3842_s5 = scalar_select %p57_p6, %s3618_s11, %s59_s23  }
  0x4f   : > { %p4588_p12 = scmp.eq.s32.totalorder %s3630_s14, 0  ;;  %p4589_p5 = scmp.eq.s32.totalorder %s3746_s15, 0 }
  0x50   : > { %s214_s22 = sand.u32 1, %s3618_s11   ;;  %s2818_s25 = sshll.u32 %s3626_s13, 9 }
  0x51   : > { %p68_p3 = por %p4588_p12, %p66_p7  ;;  %p3848_p9 = por %p4589_p5, %p72_p11 }
  0x52   : > { %s2693_s19 = sshll.u32 %s214_s22, 9  ;;  %s4591_s2 = sld [smem:[#allocation39_spill]] }
  0x53   : > { %s4590_s24 = scalar_select %p3848_p9, 1, 0 }
  0x54   : > { %s218_s27 = scalar_lea.vmem [#allocation6], %s2693_s19  ;;  %p4592_p13 = scmp.lt.s32.totalorder %s3630_s14, 2 }
  0x55   : > { %s228_s18 = sshll.u32 %s218_s27, 4  ;;  %s215_s23 = scalar_lea.sflag [#allocation7], %s214_s22  ;;  %s229_s18 = int_to_ptr.vmem [resolvable:$true] %s228_s18 }
  0x56   : > { %p3859_p10 = pnand %p4592_p13, %p68_p3  ;;  %s3451_s6 = scalar_lea.vmem %s229_s18, 8192 }
  0x57   : > { %p3452_p1 = scmp.ne.s32.totalorder %s229_s18, %s3451_s6  ;;  %s3637_s8 = smov [#allocation6]  }
  0x58   : > { %s227_s28 = scalar_lea.hbm %s4591_s2, %s2818_s25  ;;  %p3440_p0 = pneg %p3859_p10 }
  0x59   : > { %s3456_s3 = sshll.u32 %s3637_s8, 4  ;;  %s3457_s3 = int_to_ptr.vmem [resolvable:$false] %s3456_s3 }
  0x5a   : > { %p3454_p2 = pnand %p3452_p1, %p3440_p0  ;;  %s3458_s25 = scalar_lea.vmem %s3457_s3, 16384 }
  0x5b   : > { %p3459_p8 = scmp.lt.s32.totalorder %s229_s18, %s3457_s3  ;;  %p3460_p6 = scmp.lt.s32.totalorder %s3458_s25, %s3451_s6 }
  0x5c   : > { %p3455_p4 = pneg %p3454_p2 }
  0x5d   : > { %p3461_p7 = por %p3460_p6, %p3459_p8 }
  0x5f   : > { %p3462_p11 = pnand %p3461_p7, %p3455_p4 }
  0x61   : > { %3465 = shalt.err (!%p3462_p11)
}
  0x62   : > { %s3638_s19 = smov 1024   ;;  %s3639_s8 = smov 512  }
  0x63   : > { %s3640_s3 = smov 32   ;;  %s110_s6 = sld [smem:[#allocation5 + %s3626_s13]] }
  0x64   : > { %3229 = dma.hbm_to_vmem [thread:$0]  (!%p3859_p10), %s227_s28, 8192, %s229_s18, %s215_s23, %s3638_s19, %s3639_s8, %s3640_s3  }
  0x65   : > { %s111_s22 = sld [smem:[#allocation5 + %s4666_s16]]  ;;  %p124_p12 = scmp.ne.s32.totalorder %s3594_s29, %s3590_s1 }
  0x66   : > { %p130_p3 = scmp.ne.s32.totalorder %s3590_s1, %s3586_s0  ;;  %s262_s30 = sand.u32 1, %s3594_s29  }
  0x67   : > { %p4595_p0 = scmp.eq.s32.totalorder %s3630_s14, 0  ;;  %s117_s27 = sadd.s32 1, %s3594_s29 }
  0x68   : > { %p3875_p13 = por %p130_p3, %p4589_p5  ;;  %s2699_s2 = sshll.u32 %s262_s30, 6 }
  0x69   : > { %p126_p1 = por %p124_p12, %p4595_p0  ;;  %p4596_p4 = scmp.lt.s32.totalorder %s3630_s14, 2 }
  0x6a   : > { %s4594_s26 = scalar_select %p3875_p13, 1, 0 }
  0x6b   : > { %s112_s25 = ssub.s32 %s110_s6, %s111_s22  ;;  %p3885_p10 = pnand %p4596_p4, %p126_p1 }
  0x6c   : > { %p115_p2 = scmp.eq.s32.totalorder %s112_s25, 0  ;;  %p4598_p8 = pmov %p4596_p4 }
  0x6d   : > { %s3216_s18 = scalar_select %p126_p1, [#allocation5], [#allocation14] }
  0x6e   : > { %s3890_s0 = scalar_select %p115_p2, %s3594_s29, %s117_s27  }
  0x6f   : > { %s3217_s9 = scalar_select %p126_p1, %s3626_s13, 0 }
  0x70   : > { %s4672_s18 = smov (!%p4598_p8, %s3216_s18), [#allocation16]  ;;  %p4599_p6 = pmov %p4596_p4 }
  0x71   : > { %s264_s19 = scalar_lea.vmem [#allocation11], %s2699_s2  ;;  %p3468_p11 = pneg %p3885_p10 }
  0x72   : > { %s4674_s9 = smov (!%p4599_p6, %s3217_s9), 0  ;;  %s273_s8 = sshll.u32 %s264_s19, 4  ;;  %s3897_s8 = int_to_ptr.vmem [resolvable:$true] %s273_s8 }
  0x73   : > { %s265_s23 = sld [smem:[%s4672_s18 + %s4674_s9]]  ;;  %s3471_s18 = scalar_lea.hbm %s4563_s4, 2048 }
  0x79   : > { %s2820_s3 = sshll.u32 %s265_s23, 10 }
  0x7a   : > { %s3902_s30 = scalar_lea.hbm %s4563_s4, %s2820_s3 }
  0x7b   : > { %s3466_s27 = scalar_lea.hbm %s3902_s30, 1024  ;;  %p3472_p5 = scmp.lt.s32.totalorder %s3902_s30, %s4563_s4 }
  0x7c   : > { %p3467_p7 = scmp.ne.s32.totalorder %s3902_s30, %s3466_s27  ;;  %p3473_p0 = scmp.lt.s32.totalorder %s3471_s18, %s3466_s27 }
  0x7e   : > { %p3469_p12 = pnand %p3468_p11, %p3467_p7  ;;  %p3474_p1 = por %p3473_p0, %p3472_p5 }
  0x80   : > { %p3470_p3 = pneg %p3469_p12 }
  0x82   : > { %p3475_p2 = pnand %p3474_p1, %p3470_p3 }
  0x84   : > { %3478 = shalt.err (!%p3475_p2)
}
  0x85   : > { %s3479_s19 = scalar_lea.vmem %s3897_s8, 1024  ;;  %s3641_s3 = smov [#allocation11]  }
  0x86   : > { %p3480_p4 = scmp.ne.s32.totalorder %s3897_s8, %s3479_s19  ;;  %s3484_s6 = sshll.u32 %s3641_s3, 4  ;;  %s3485_s6 = int_to_ptr.vmem [resolvable:$false] %s3484_s6 }
  0x87   : > { %s3486_s22 = scalar_lea.vmem %s3485_s6, 2048  ;;  %p3487_p7 = scmp.lt.s32.totalorder %s3897_s8, %s3485_s6 }
  0x88   : > { %p3482_p8 = pnand %p3480_p4, %p3468_p11  ;;  %p3488_p12 = scmp.lt.s32.totalorder %s3486_s22, %s3479_s19 }
  0x8a   : > { %p3483_p6 = pneg %p3482_p8  ;;  %p3489_p13 = por %p3488_p12, %p3487_p7 }
  0x8c   : > { %p3490_p9 = pnand %p3489_p13, %p3483_p6 }
  0x8e   : > { %3493 = shalt.err (!%p3490_p9)
}
  0x8f   : > { %s4600_s27 = smov 4   ;;  %s4601_s25 = smov 64  }
  0x90   : > { %3239 = dma.hbm_to_vmem [thread:$0]  (!%p3885_p10), %s3902_s30, 1024, %s3897_s8, %s3809_s20, %s4601_s25, %s4601_s25, %s4600_s27  }
  0x91   : > { %p4602_p11 = scmp.ne.s32.totalorder %s4586_s17, 0 }
  0x93   : > { %285 = sbr.rel (%p4602_p11) target bundleno = 1084 (0x43c), region = 36 }
  0x98   : > { %s287_s2 = sand.u32 1, %s3614_s10   ;;  %p4603_p9 = scmp.ne.s32.totalorder %s4590_s24, 0 }
  0x99   : > { %s2703_s18 = sshll.u32 %s287_s2, 9  ;;  %s288_s9 = scalar_lea.sflag [#allocation7], %s287_s2 }
  0x9a   : > { %s3929_s23 = scalar_lea.vmem [#allocation6], %s2703_s18 }
  0x9b   : > { %3569 = dma.done.wait (%p4603_p9), %s288_s9, 8192  }
  0x9c   : > { %3571 = vsyncadd (%p4603_p9), %s288_s9, 4294959104  ;;  %s296_s28 = sand.u32 1, %s3746_s15   ;;  %s298_s20 = sand.u32 1, %s3602_s7  }
  0x9d   : > { %s2704_s8 = sshll.u32 %s298_s20, 8  ;;  %s297_s17 = scalar_lea.sflag [#allocation10], %s296_s28 }
  0x9e   : > { %s3937_s30 = scalar_lea.vmem [#allocation9], %s2704_s8  ;;  %p4604_p13 = scmp.ne.s32.totalorder %s4583_s21, 0 }
  0xa0   : > { %3573 = dma.done.wait (%p4604_p13), %s297_s17, 4096  }
  0xa1   : > { %3575 = vsyncadd (%p4604_p13), %s297_s17, 4294963200  ;;  %s307_s19 = sand.u32 1, %s3590_s1   ;;  %p4605_p10 = scmp.ne.s32.totalorder %s4594_s26, 0 }
  0xa2   : > { %s2705_s3 = sshll.u32 %s307_s19, 6 }
  0xa3   : > { %s3944_s24 = scalar_lea.vmem [#allocation11], %s2705_s3 }
  0xa4   : > { %3577 = dma.done.wait (%p4605_p10), %s297_s17, 1024  }
  0xa5   : > { %3579 = vsyncadd (%p4605_p10), %s297_s17, 4294966272  ;;  %v3350_v0 = vld [vmem:[%s3944_s24 + $0x38] sm:$0xff]   ;;  %v3351_v1 = vld [vmem:[%s3944_s24 + $0x30] sm:$0xff]   ;;  %v3642_v40 = vmov 0   ;;  %p2746_p3 = scmp.ne.s32.totalorder %s3622_s12, 0 }
  0xa6   : > { %3116 = vmatprep.subr.bf16.mxu0 %v3350_v0  ;;  %3196 = vmatprep.subr.bf16.mxu1 %v3350_v0  ;;  %v3352_v2 = vld [vmem:[%s3944_s24 + $0x28] sm:$0xff]   ;;  %v3353_v3 = vld [vmem:[%s3944_s24 + $0x20] sm:$0xff]   ;;  %v3354_v6 = vld [vmem:[%s3944_s24 + $0x18] sm:$0xff]  }
  0xa7   : > { %3117 = vmatpush3.bf16.msra.mxu0 %v3350_v0  ;;  %3204 = vmatpush3.bf16.msra.mxu1 %v3350_v0  ;;  %v3358_v4 = vld [vmem:[%s3937_s30] sm:$0xff]   ;;  %v3355_v7 = vld [vmem:[%s3944_s24 + $0x10] sm:$0xff]   ;;  %v3356_v8 = vld [vmem:[%s3944_s24 + $0x8] sm:$0xff]  }
  0xa8   : > { %3118 = vmatprep.subr.bf16.mxu0 %v3351_v1  ;;  %3197 = vmatprep.subr.bf16.mxu1 %v3351_v1  ;;  %v3359_v5 = vld [vmem:[%s3937_s30 + $0x80] sm:$0xff]   ;;  %v3360_v10 = vld [vmem:[%s3937_s30 + $0x8] sm:$0xff]   ;;  %v3362_v12 = vld [vmem:[%s3937_s30 + $0x10] sm:$0xff]  }
  0xa9   : > { %3132 = vmatprep.mubr.bf16.mxu0 %v3358_v4  ;;  %3164 = vmatprep.mubr.bf16.mxu1 %v3359_v5  ;;  %v3357_v9 = vld [vmem:[%s3944_s24] sm:$0xff]   ;;  %v3361_v11 = vld [vmem:[%s3937_s30 + $0x88] sm:$0xff]   ;;  %v3363_v13 = vld [vmem:[%s3937_s30 + $0x90] sm:$0xff]  }
  0xaa   : > { %v3364_v14 = vld [vmem:[%s3937_s30 + $0x18] sm:$0xff]   ;;  %v3366_v16 = vld [vmem:[%s3937_s30 + $0x20] sm:$0xff]   ;;  %v3368_v18 = vld [vmem:[%s3937_s30 + $0x28] sm:$0xff]  }
  0xab   : > { %3119 = vmatpush3.bf16.msra.mxu0 %v3351_v1  ;;  %3205 = vmatpush3.bf16.msra.mxu1 %v3351_v1  ;;  %v3365_v15 = vld [vmem:[%s3937_s30 + $0x98] sm:$0xff]   ;;  %v3367_v17 = vld [vmem:[%s3937_s30 + $0xa0] sm:$0xff]   ;;  %v3369_v19 = vld [vmem:[%s3937_s30 + $0xa8] sm:$0xff]  }
  0xac   : > { %3120 = vmatprep.subr.bf16.mxu0 %v3352_v2  ;;  %3198 = vmatprep.subr.bf16.mxu1 %v3352_v2  ;;  %v3370_v20 = vld [vmem:[%s3937_s30 + $0x30] sm:$0xff]   ;;  %v3372_v22 = vld [vmem:[%s3937_s30 + $0x38] sm:$0xff]   ;;  %v3374_v24 = vld [vmem:[%s3937_s30 + $0x40] sm:$0xff]  }
  0xad   : > { %v3371_v21 = vld [vmem:[%s3937_s30 + $0xb0] sm:$0xff]   ;;  %v3373_v23 = vld [vmem:[%s3937_s30 + $0xb8] sm:$0xff]   ;;  %v3375_v25 = vld [vmem:[%s3937_s30 + $0xc0] sm:$0xff]  }
  0xae   : > { %v3376_v26 = vld [vmem:[%s3937_s30 + $0x48] sm:$0xff]   ;;  %v3378_v28 = vld [vmem:[%s3937_s30 + $0x50] sm:$0xff]   ;;  %v3380_v30 = vld [vmem:[%s3937_s30 + $0x58] sm:$0xff]  }
  0xaf   : > { %3121 = vmatpush3.bf16.msra.mxu0 %v3352_v2  ;;  %3206 = vmatpush3.bf16.msra.mxu1 %v3352_v2  ;;  %v3377_v27 = vld [vmem:[%s3937_s30 + $0xc8] sm:$0xff]   ;;  %v3379_v29 = vld [vmem:[%s3937_s30 + $0xd0] sm:$0xff]   ;;  %v3381_v31 = vld [vmem:[%s3937_s30 + $0xd8] sm:$0xff]  }
  0xb0   : > { %3122 = vmatprep.subr.bf16.mxu0 %v3353_v3  ;;  %3199 = vmatprep.subr.bf16.mxu1 %v3353_v3  ;;  %v3382_v32 = vld [vmem:[%s3937_s30 + $0x60] sm:$0xff]   ;;  %v3384_v34 = vld [vmem:[%s3937_s30 + $0x68] sm:$0xff]   ;;  %v3386_v36 = vld [vmem:[%s3937_s30 + $0x70] sm:$0xff]  }
  0xb1   : > { %v3383_v33 = vld [vmem:[%s3937_s30 + $0xe0] sm:$0xff]   ;;  %v3385_v35 = vld [vmem:[%s3937_s30 + $0xe8] sm:$0xff]   ;;  %v3387_v37 = vld [vmem:[%s3937_s30 + $0xf0] sm:$0xff]  }
  0xb2   : > { %v3388_v38 = vld [vmem:[%s3937_s30 + $0x78] sm:$0xff]   ;;  %v3993_v41 = vld [vmem:[%s3929_s23 + $0x8] sm:$0xff] }
  0xb3   : > { %3123 = vmatpush3.bf16.msra.mxu0 %v3353_v3  ;;  %3207 = vmatpush3.bf16.msra.mxu1 %v3353_v3  ;;  %v3389_v39 = vld [vmem:[%s3937_s30 + $0xf8] sm:$0xff]   ;;  %v1058_v43 = vunpack.c.l.s8.bf16 %v3993_v41 }
  0xb4   : > { %3124 = vmatprep.subr.bf16.mxu0 %v3354_v6  ;;  %3200 = vmatprep.subr.bf16.mxu1 %v3354_v6  ;;  %v3996_v42 = vld [vmem:[%s3929_s23 + $0x18] sm:$0xff] }
  0xb5   : > { %v1060_v44 = vunpack.c.l.s8.bf16 %v3996_v42 }
  0xb7   : > { %3125 = vmatpush3.bf16.msra.mxu0 %v3354_v6  ;;  %3208 = vmatpush3.bf16.msra.mxu1 %v3354_v6 }
  0xb8   : > { %3126 = vmatprep.subr.bf16.mxu0 %v3355_v7  ;;  %3201 = vmatprep.subr.bf16.mxu1 %v3355_v7 }
  0xbb   : > { %3127 = vmatpush3.bf16.msra.mxu0 %v3355_v7  ;;  %3209 = vmatpush3.bf16.msra.mxu1 %v3355_v7 }
  0xbc   : > { %3128 = vmatprep.subr.bf16.mxu0 %v3356_v8  ;;  %3202 = vmatprep.subr.bf16.mxu1 %v3356_v8 }
  0xbf   : > { %3129 = vmatpush3.bf16.msra.mxu0 %v3356_v8  ;;  %3210 = vmatpush3.bf16.msra.mxu1 %v3356_v8 }
  0xc0   : > { %3130 = vmatprep.subr.bf16.mxu0 %v3357_v9  ;;  %3203 = vmatprep.subr.bf16.mxu1 %v3357_v9 }
  0xc3   : > { %3131 = vmatpush3.bf16.msra.mxu0 %v3357_v9  ;;  %3211 = vmatpush3.bf16.msra.mxu1 %v3357_v9 }
  0xc4   : > { %1185 = vmatprep.subr.bf16.mxu1 %v3642_v40  ;;  %1474 = vmatprep.subr.bf16.mxu0 %v3642_v40 }
  0xc6   : > { %3133 = vmatmul.mubr.bf16.vlgmr.msra.gmra.mxu0 %v3360_v10  ;;  %3165 = vmatmul.mubr.bf16.vlgmr.msra.gmra.mxu1 %v3361_v11 }
  0xc7   : > { %3136 = vmatprep.mubr.bf16.mxu0 %v3362_v12  ;;  %3168 = vmatprep.mubr.bf16.mxu1 %v3363_v13 }
  0xce   : > { %3137 = vmatmul.mubr.bf16.gmra.mxu0 %v3364_v14  ;;  %3169 = vmatmul.mubr.bf16.gmra.mxu1 %v3365_v15 }
  0xcf   : > { %3140 = vmatprep.mubr.bf16.mxu0 %v3366_v16  ;;  %3172 = vmatprep.mubr.bf16.mxu1 %v3367_v17 }
  0xd6   : > { %3141 = vmatmul.mubr.bf16.gmra.mxu0 %v3368_v18  ;;  %3173 = vmatmul.mubr.bf16.gmra.mxu1 %v3369_v19 }
  0xd7   : > { %3144 = vmatprep.mubr.bf16.mxu0 %v3370_v20  ;;  %3176 = vmatprep.mubr.bf16.mxu1 %v3371_v21 }
  0xde   : > { %3145 = vmatmul.mubr.bf16.gmra.mxu0 %v3372_v22  ;;  %3177 = vmatmul.mubr.bf16.gmra.mxu1 %v3373_v23 }
  0xdf   : > { %3148 = vmatprep.mubr.bf16.mxu0 %v3374_v24  ;;  %3180 = vmatprep.mubr.bf16.mxu1 %v3375_v25 }
  0xe6   : > { %3149 = vmatmul.mubr.bf16.gmra.mxu0 %v3376_v26  ;;  %3181 = vmatmul.mubr.bf16.gmra.mxu1 %v3377_v27 }
  0xe7   : > { %3152 = vmatprep.mubr.bf16.mxu0 %v3378_v28  ;;  %3184 = vmatprep.mubr.bf16.mxu1 %v3379_v29 }
  0xee   : > { %3153 = vmatmul.mubr.bf16.gmra.mxu0 %v3380_v30  ;;  %3185 = vmatmul.mubr.bf16.gmra.mxu1 %v3381_v31 }
  0xef   : > { %3156 = vmatprep.mubr.bf16.mxu0 %v3382_v32  ;;  %3188 = vmatprep.mubr.bf16.mxu1 %v3383_v33 }
  0xf6   : > { %3157 = vmatmul.mubr.bf16.gmra.mxu0 %v3384_v34  ;;  %3189 = vmatmul.mubr.bf16.gmra.mxu1 %v3385_v35 }
  0xf7   : > { %3160 = vmatprep.mubr.bf16.mxu0 %v3386_v36  ;;  %3192 = vmatprep.mubr.bf16.mxu1 %v3387_v37 }
  0xfe   : > { %3161 = vmatmul.mubr.bf16.gmra.mxu0 %v3388_v38  ;;  %3193 = vmatmul.mubr.bf16.gmra.mxu1 %v3389_v39 }
  0xff   : > { %1217 = vmatprep.mubr.bf16.mxu1 %v1058_v43  ;;  %1506 = vmatprep.mubr.bf16.mxu0 %v1060_v44 }
 0x186   : > { %v4000_v45 = vpop.f32.mrf.mxu0  ;;  %v4002_v46 = vpop.f32.mrf.mxu1 }
 0x188   : > { %v4004_v47 = vpop.f32.mrf.mxu0  ;;  %v4006_v48 = vpop.f32.mrf.mxu1 }
 0x18a   : > { %v4008_v49 = vpop.f32.mrf.mxu0  ;;  %v4010_v50 = vpop.f32.mrf.mxu1 }
 0x18c   : > { %v4012_v51 = vpop.f32.mrf.mxu0  ;;  %v4014_v52 = vpop.f32.mrf.mxu1 }
 0x18e   : > { %v4016_v53 = vpop.f32.mrf.mxu0  ;;  %v4018_v54 = vpop.f32.mrf.mxu1 }
 0x190   : > { %v4020_v55 = vpop.f32.mrf.mxu0  ;;  %v4022_v56 = vpop.f32.mrf.mxu1 }
 0x192   : > { %v3139_v57 = vpop.f32.mrf.mxu0  ;;  %v3171_v58 = vpop.f32.mrf.mxu1 }
 0x193   : > { %v964_v35 = vpack.c.bf16 %v3139_v57, %v4016_v53  ;;  %v980_v36 = vpack.c.bf16 %v3171_v58, %v4018_v54 }
 0x194   : > { %v4024_v59 = vpop.f32.mrf.mxu0  ;;  %v4026_v60 = vpop.f32.mrf.mxu1 }
 0x195   : > { %v963_v44 = vpack.c.bf16 %v4024_v59, %v4020_v55  ;;  %v979_v53 = vpack.c.bf16 %v4026_v60, %v4022_v56 }
 0x196   : > { %v3142_v61 = vpop.f32.mrf.mxu0  ;;  %v3174_v62 = vpop.f32.mrf.mxu1 }
 0x198   : > { %v738_v63 = vpop.f32.mrf.mxu0  ;;  %v866_v0 = vpop.f32.mrf.mxu1 }
 0x19a   : > { %v3143_v1 = vpop.f32.mrf.mxu0  ;;  %v3175_v2 = vpop.f32.mrf.mxu1 }
 0x19b   : > { %v966_v23 = vpack.c.bf16 %v3143_v1, %v3142_v61  ;;  %v982_v24 = vpack.c.bf16 %v3175_v2, %v3174_v62  ;;  %v962_v62 = vpack.c.bf16 %v4008_v49, %v4000_v45  ;;  %v977_v1 = vpack.c.bf16 %v4014_v52, %v4006_v48 }
 0x19c   : > { %v741_v3 = vpop.f32.mrf.mxu0  ;;  %v869_v4 = vpop.f32.mrf.mxu1 }
 0x19d   : > { %v965_v29 = vpack.c.bf16 %v741_v3, %v738_v63  ;;  %v981_v30 = vpack.c.bf16 %v869_v4, %v866_v0  ;;  %v978_v63 = vpack.c.bf16 %v4010_v50, %v4002_v46  ;;  %v961_v0 = vpack.c.bf16 %v4012_v51, %v4004_v47 }
 0x19e   : > { %v3146_v5 = vpop.f32.mrf.mxu0  ;;  %v3178_v6 = vpop.f32.mrf.mxu1 }
 0x1a0   : > { %v754_v7 = vpop.f32.mrf.mxu0  ;;  %v882_v8 = vpop.f32.mrf.mxu1 }
 0x1a2   : > { %v3147_v9 = vpop.f32.mrf.mxu0  ;;  %v3179_v10 = vpop.f32.mrf.mxu1 }
 0x1a3   : > { %v968_v11 = vpack.c.bf16 %v3147_v9, %v3146_v5  ;;  %v984_v12 = vpack.c.bf16 %v3179_v10, %v3178_v6 }
 0x1a4   : > { %v757_v13 = vpop.f32.mrf.mxu0  ;;  %v885_v14 = vpop.f32.mrf.mxu1 }
 0x1a5   : > { %1186 = vmatpush1.bf16.msra.mxu1 %v968_v11  ;;  %1475 = vmatpush1.bf16.msra.mxu0 %v984_v12  ;;  %v967_v17 = vpack.c.bf16 %v757_v13, %v754_v7  ;;  %v983_v18 = vpack.c.bf16 %v885_v14, %v882_v8  ;;  %v993_v14 = vld [vmem:[%s3929_s23] sm:$0xff] }
 0x1a6   : > { %v4028_v15 = vpop.f32.mrf.mxu0  ;;  %v4030_v16 = vpop.f32.mrf.mxu1  ;;  %1187 = vmatprep.subr.bf16.mxu1 %v3642_v40  ;;  %1476 = vmatprep.subr.bf16.mxu0 %v3642_v40 }
 0x1a8   : > { %v4034_v19 = vpop.f32.mrf.mxu0  ;;  %v4036_v20 = vpop.f32.mrf.mxu1 }
 0x1a9   : > { %1188 = vmatpush1.bf16.msra.mxu1 %v967_v17  ;;  %1477 = vmatpush1.bf16.msra.mxu0 %v983_v18  ;;  %v995_v17 = vld [vmem:[%s3929_s23 + $0x10] sm:$0xff] }
 0x1aa   : > { %v4038_v21 = vpop.f32.mrf.mxu0  ;;  %v4040_v22 = vpop.f32.mrf.mxu1  ;;  %1189 = vmatprep.subr.bf16.mxu1 %v3642_v40  ;;  %1478 = vmatprep.subr.bf16.mxu0 %v3642_v40 }
 0x1ab   : > { %v970_v12 = vpack.c.bf16 %v4038_v21, %v4028_v15  ;;  %v986_v13 = vpack.c.bf16 %v4040_v22, %v4030_v16  ;;  %v1057_v15 = vunpack.c.l.s8.bf16 %v993_v14  ;;  %v1059_v21 = vunpack.c.l.s8.bf16 %v995_v17 }
 0x1ac   : > { %v4044_v25 = vpop.f32.mrf.mxu0  ;;  %v4046_v26 = vpop.f32.mrf.mxu1  ;;  %v1062_v16 = vunpack.c.h.s8.bf16 %v3993_v41  ;;  %v1064_v22 = vunpack.c.h.s8.bf16 %v3996_v42  ;;  %v997_v41 = vld [vmem:[%s3929_s23 + $0x20] sm:$0xff] }
 0x1ad   : > { %1190 = vmatpush1.bf16.msra.mxu1 %v966_v23  ;;  %1479 = vmatpush1.bf16.msra.mxu0 %v982_v24  ;;  %v969_v18 = vpack.c.bf16 %v4044_v25, %v4034_v19  ;;  %v985_v23 = vpack.c.bf16 %v4046_v26, %v4036_v20  ;;  %v1000_v24 = vld [vmem:[%s3929_s23 + $0x38] sm:$0xff]  ;;  %v1061_v19 = vunpack.c.h.s8.bf16 %v993_v14  ;;  %v1063_v25 = vunpack.c.h.s8.bf16 %v995_v17  ;;  %v999_v26 = vld [vmem:[%s3929_s23 + $0x30] sm:$0xff] }
 0x1ae   : > { %v4048_v27 = vpop.f32.mrf.mxu0  ;;  %v4050_v28 = vpop.f32.mrf.mxu1  ;;  %1191 = vmatprep.subr.bf16.mxu1 %v3642_v40  ;;  %1480 = vmatprep.subr.bf16.mxu0 %v3642_v40  ;;  %v1068_v20 = vunpack.c.l.s8.bf16 %v1000_v24  ;;  %v1065_v42 = vunpack.c.l.s8.bf16 %v997_v41 }
 0x1b0   : > { %v4054_v31 = vpop.f32.mrf.mxu0  ;;  %v4056_v32 = vpop.f32.mrf.mxu1 }
 0x1b1   : > { %1192 = vmatpush1.bf16.msra.mxu1 %v965_v29  ;;  %1481 = vmatpush1.bf16.msra.mxu0 %v981_v30  ;;  %v1072_v30 = vunpack.c.h.s8.bf16 %v1000_v24 }
 0x1b2   : > { %v4058_v33 = vpop.f32.mrf.mxu0  ;;  %v4060_v34 = vpop.f32.mrf.mxu1  ;;  %1193 = vmatprep.subr.bf16.mxu1 %v3642_v40  ;;  %1482 = vmatprep.subr.bf16.mxu0 %v3642_v40 }
 0x1b3   : > { %v972_v8 = vpack.c.bf16 %v4058_v33, %v4048_v27  ;;  %v988_v9 = vpack.c.bf16 %v4060_v34, %v4050_v28  ;;  %v1067_v28 = vunpack.c.l.s8.bf16 %v999_v26  ;;  %v1069_v33 = vunpack.c.h.s8.bf16 %v997_v41 }
 0x1b4   : > { %v4066_v37 = vpop.f32.mrf.mxu0  ;;  %v4068_v38 = vpop.f32.mrf.mxu1  ;;  %v1071_v34 = vunpack.c.h.s8.bf16 %v999_v26 }
 0x1b5   : > { %1194 = vmatpush1.bf16.msra.mxu1 %v964_v35  ;;  %1483 = vmatpush1.bf16.msra.mxu0 %v980_v36  ;;  %v971_v10 = vpack.c.bf16 %v4066_v37, %v4054_v31  ;;  %v987_v11 = vpack.c.bf16 %v4068_v38, %v4056_v32  ;;  %v1002_v31 = vld [vmem:[%s3929_s23 + $0x48] sm:$0xff]  ;;  %v1004_v32 = vld [vmem:[%s3929_s23 + $0x58] sm:$0xff]  ;;  %v1001_v37 = vld [vmem:[%s3929_s23 + $0x40] sm:$0xff] }
 0x1b6   : > { %v3158_v39 = vpop.f32.mrf.mxu0  ;;  %v3190_v43 = vpop.f32.mrf.mxu1  ;;  %1195 = vmatprep.subr.bf16.mxu1 %v3642_v40  ;;  %1484 = vmatprep.subr.bf16.mxu0 %v3642_v40  ;;  %v1074_v35 = vunpack.c.l.s8.bf16 %v1002_v31  ;;  %v1076_v36 = vunpack.c.l.s8.bf16 %v1004_v32  ;;  %v1003_v38 = vld [vmem:[%s3929_s23 + $0x50] sm:$0xff] }
 0x1b8   : > { %v802_v57 = vpop.f32.mrf.mxu0  ;;  %v930_v54 = vpop.f32.mrf.mxu1 }
 0x1b9   : > { %1196 = vmatpush1.bf16.msra.mxu1 %v963_v44  ;;  %1485 = vmatpush1.bf16.msra.mxu0 %v979_v53  ;;  %v1078_v44 = vunpack.c.h.s8.bf16 %v1002_v31  ;;  %v1080_v53 = vunpack.c.h.s8.bf16 %v1004_v32 }
 0x1ba   : > { %v3159_v58 = vpop.f32.mrf.mxu0  ;;  %v3191_v61 = vpop.f32.mrf.mxu1  ;;  %1197 = vmatprep.subr.bf16.mxu1 %v3642_v40  ;;  %1486 = vmatprep.subr.bf16.mxu0 %v3642_v40 }
 0x1bb   : > { %v974_v51 = vpack.c.bf16 %v3159_v58, %v3158_v39  ;;  %v990_v52 = vpack.c.bf16 %v3191_v61, %v3190_v43  ;;  %v1073_v39 = vunpack.c.l.s8.bf16 %v1001_v37  ;;  %v1075_v43 = vunpack.c.l.s8.bf16 %v1003_v38 }
 0x1bc   : > { %v805_v55 = vpop.f32.mrf.mxu0  ;;  %v933_v59 = vpop.f32.mrf.mxu1  ;;  %v1077_v58 = vunpack.c.h.s8.bf16 %v1001_v37  ;;  %v1079_v61 = vunpack.c.h.s8.bf16 %v1003_v38 }
 0x1bd   : > { %1198 = vmatpush1.bf16.msra.mxu1 %v962_v62  ;;  %1487 = vmatpush1.bf16.msra.mxu0 %v978_v63  ;;  %v973_v6 = vpack.c.bf16 %v805_v55, %v802_v57  ;;  %v989_v7 = vpack.c.bf16 %v933_v59, %v930_v54  ;;  %v1006_v57 = vld [vmem:[%s3929_s23 + $0x68] sm:$0xff]  ;;  %v1008_v54 = vld [vmem:[%s3929_s23 + $0x78] sm:$0xff]  ;;  %v1005_v55 = vld [vmem:[%s3929_s23 + $0x60] sm:$0xff] }
 0x1be   : > { %v3162_v56 = vpop.f32.mrf.mxu0  ;;  %v3194_v60 = vpop.f32.mrf.mxu1  ;;  %1199 = vmatprep.subr.bf16.mxu1 %v3642_v40  ;;  %1488 = vmatprep.subr.bf16.mxu0 %v3642_v40  ;;  %v1082_v62 = vunpack.c.l.s8.bf16 %v1006_v57  ;;  %v1084_v63 = vunpack.c.l.s8.bf16 %v1008_v54  ;;  %v1007_v59 = vld [vmem:[%s3929_s23 + $0x70] sm:$0xff] }
 0x1c0   : > { %v818_v45 = vpop.f32.mrf.mxu0  ;;  %v946_v49 = vpop.f32.mrf.mxu1 }
 0x1c1   : > { %1200 = vmatpush1.bf16.msra.mxu1 %v961_v0  ;;  %1489 = vmatpush1.bf16.msra.mxu0 %v977_v1  ;;  %v1086_v0 = vunpack.c.h.s8.bf16 %v1006_v57  ;;  %v1088_v1 = vunpack.c.h.s8.bf16 %v1008_v54 }
 0x1c2   : > { %v3163_v46 = vpop.f32.mrf.mxu0  ;;  %v3195_v50 = vpop.f32.mrf.mxu1  ;;  %1201 = vmatprep.subr.bf16.mxu1 %v3642_v40  ;;  %1490 = vmatprep.subr.bf16.mxu0 %v3642_v40 }
 0x1c3   : > { %v976_v2 = vpack.c.bf16 %v3163_v46, %v3162_v56  ;;  %v992_v3 = vpack.c.bf16 %v3195_v50, %v3194_v60  ;;  %v1081_v56 = vunpack.c.l.s8.bf16 %v1005_v55  ;;  %v1083_v60 = vunpack.c.l.s8.bf16 %v1007_v59 }
 0x1c4   : > { %v821_v4 = vpop.f32.mrf.mxu0  ;;  %v949_v5 = vpop.f32.mrf.mxu1  ;;  %v1085_v46 = vunpack.c.h.s8.bf16 %v1005_v55  ;;  %v1087_v50 = vunpack.c.h.s8.bf16 %v1007_v59 }
 0x1c5   : > { %1202 = vmatpush2.bf16.msra.mxu1 %v976_v2  ;;  %1491 = vmatpush2.bf16.msra.mxu0 %v992_v3  ;;  %v975_v47 = vpack.c.bf16 %v821_v4, %v818_v45  ;;  %v991_v48 = vpack.c.bf16 %v949_v5, %v946_v49  ;;  %v1010_v45 = vld [vmem:[%s3929_s23 + $0x88] sm:$0xff]  ;;  %v1012_v49 = vld [vmem:[%s3929_s23 + $0x98] sm:$0xff]  ;;  %v1009_v4 = vld [vmem:[%s3929_s23 + $0x80] sm:$0xff] }
 0x1c6   : > { %1203 = vmatprep.subr.bf16.mxu1 %v3642_v40  ;;  %1492 = vmatprep.subr.bf16.mxu0 %v3642_v40  ;;  %v1090_v2 = vunpack.c.l.s8.bf16 %v1010_v45  ;;  %v1092_v3 = vunpack.c.l.s8.bf16 %v1012_v49  ;;  %v1011_v5 = vld [vmem:[%s3929_s23 + $0x90] sm:$0xff] }
 0x1c9   : > { %1204 = vmatpush2.bf16.msra.mxu1 %v975_v47  ;;  %1493 = vmatpush2.bf16.msra.mxu0 %v991_v48  ;;  %v1089_v47 = vunpack.c.l.s8.bf16 %v1009_v4  ;;  %v1091_v48 = vunpack.c.l.s8.bf16 %v1011_v5 }
 0x1ca   : > { %1205 = vmatprep.subr.bf16.mxu1 %v3642_v40  ;;  %1494 = vmatprep.subr.bf16.mxu0 %v3642_v40 }
 0x1cd   : > { %1206 = vmatpush2.bf16.msra.mxu1 %v974_v51  ;;  %1495 = vmatpush2.bf16.msra.mxu0 %v990_v52  ;;  %v1094_v51 = vunpack.c.h.s8.bf16 %v1010_v45  ;;  %v1096_v52 = vunpack.c.h.s8.bf16 %v1012_v49 }
 0x1ce   : > { %1207 = vmatprep.subr.bf16.mxu1 %v3642_v40  ;;  %1496 = vmatprep.subr.bf16.mxu0 %v3642_v40 }
 0x1d1   : > { %1208 = vmatpush2.bf16.msra.mxu1 %v973_v6  ;;  %1497 = vmatpush2.bf16.msra.mxu0 %v989_v7  ;;  %v1014_v6 = vld [vmem:[%s3929_s23 + $0xa8] sm:$0xff]  ;;  %v1016_v7 = vld [vmem:[%s3929_s23 + $0xb8] sm:$0xff] }
 0x1d2   : > { %1209 = vmatprep.subr.bf16.mxu1 %v3642_v40  ;;  %1498 = vmatprep.subr.bf16.mxu0 %v3642_v40 }
 0x1d5   : > { %1210 = vmatpush2.bf16.msra.mxu1 %v972_v8  ;;  %1499 = vmatpush2.bf16.msra.mxu0 %v988_v9  ;;  %v1093_v8 = vunpack.c.h.s8.bf16 %v1009_v4  ;;  %v1095_v9 = vunpack.c.h.s8.bf16 %v1011_v5 }
 0x1d6   : > { %1211 = vmatprep.subr.bf16.mxu1 %v3642_v40  ;;  %1500 = vmatprep.subr.bf16.mxu0 %v3642_v40 }
 0x1d9   : > { %1212 = vmatpush2.bf16.msra.mxu1 %v971_v10  ;;  %1501 = vmatpush2.bf16.msra.mxu0 %v987_v11  ;;  %v1098_v10 = vunpack.c.l.s8.bf16 %v1014_v6  ;;  %v1100_v11 = vunpack.c.l.s8.bf16 %v1016_v7 }
 0x1da   : > { %1213 = vmatprep.subr.bf16.mxu1 %v3642_v40  ;;  %1502 = vmatprep.subr.bf16.mxu0 %v3642_v40 }
 0x1dd   : > { %1214 = vmatpush2.bf16.msra.mxu1 %v970_v12  ;;  %1503 = vmatpush2.bf16.msra.mxu0 %v986_v13  ;;  %v1013_v12 = vld [vmem:[%s3929_s23 + $0xa0] sm:$0xff]  ;;  %v1015_v13 = vld [vmem:[%s3929_s23 + $0xb0] sm:$0xff] }
 0x1de   : > { %1215 = vmatprep.subr.bf16.mxu1 %v3642_v40  ;;  %1504 = vmatprep.subr.bf16.mxu0 %v3642_v40  ;;  %v998_v40 = vld [vmem:[%s3929_s23 + $0x28] sm:$0xff]  ;;  %v1097_v14 = vunpack.c.l.s8.bf16 %v1013_v12  ;;  %v1099_v17 = vunpack.c.l.s8.bf16 %v1015_v13 }
 0x1df   : > { %v1066_v27 = vunpack.c.l.s8.bf16 %v998_v40  ;;  %v1070_v29 = vunpack.c.h.s8.bf16 %v998_v40 }
 0x1e1   : > { %1216 = vmatpush2.bf16.msra.mxu1 %v969_v18  ;;  %1505 = vmatpush2.bf16.msra.mxu0 %v985_v23  ;;  %v1102_v18 = vunpack.c.h.s8.bf16 %v1014_v6  ;;  %v1104_v23 = vunpack.c.h.s8.bf16 %v1016_v7 }
 0x1e4   : > { %1218 = vmatmul.mubr.bf16.vlgmr.msra.gmra.mxu1 %v1057_v15  ;;  %1507 = vmatmul.mubr.bf16.vlgmr.msra.gmra.mxu0 %v1059_v21  ;;  %v1018_v15 = vld [vmem:[%s3929_s23 + $0xc8] sm:$0xff]  ;;  %v1020_v21 = vld [vmem:[%s3929_s23 + $0xd8] sm:$0xff] }
 0x1e5   : > { %1225 = vmatprep.mubr.bf16.mxu1 %v1062_v16  ;;  %1514 = vmatprep.mubr.bf16.mxu0 %v1064_v22  ;;  %v1101_v16 = vunpack.c.h.s8.bf16 %v1013_v12  ;;  %v1103_v22 = vunpack.c.h.s8.bf16 %v1015_v13  ;;  %v1106_v40 = vunpack.c.l.s8.bf16 %v1018_v15  ;;  %v1108_v24 = vunpack.c.l.s8.bf16 %v1020_v21 }
 0x1e6   : > { %v1110_v41 = vunpack.c.h.s8.bf16 %v1018_v15  ;;  %v1112_v26 = vunpack.c.h.s8.bf16 %v1020_v21 }
 0x1ec   : > { %1226 = vmatmul.mubr.bf16.gmra.mxu1 %v1061_v19  ;;  %1515 = vmatmul.mubr.bf16.gmra.mxu0 %v1063_v25  ;;  %v1017_v19 = vld [vmem:[%s3929_s23 + $0xc0] sm:$0xff]  ;;  %v1019_v25 = vld [vmem:[%s3929_s23 + $0xd0] sm:$0xff] }
 0x1ed   : > { %1233 = vmatprep.mubr.bf16.mxu1 %v1066_v27  ;;  %1522 = vmatprep.mubr.bf16.mxu0 %v1068_v20  ;;  %v1105_v27 = vunpack.c.l.s8.bf16 %v1017_v19  ;;  %v1107_v20 = vunpack.c.l.s8.bf16 %v1019_v25 }
 0x1f4   : > { %1234 = vmatmul.mubr.bf16.gmra.mxu1 %v1065_v42  ;;  %1523 = vmatmul.mubr.bf16.gmra.mxu0 %v1067_v28  ;;  %v1022_v42 = vld [vmem:[%s3929_s23 + $0xe8] sm:$0xff]  ;;  %v1024_v28 = vld [vmem:[%s3929_s23 + $0xf8] sm:$0xff] }
 0x1f5   : > { %1241 = vmatprep.mubr.bf16.mxu1 %v1070_v29  ;;  %1530 = vmatprep.mubr.bf16.mxu0 %v1072_v30  ;;  %v1109_v29 = vunpack.c.h.s8.bf16 %v1017_v19  ;;  %v1111_v30 = vunpack.c.h.s8.bf16 %v1019_v25  ;;  %v1114_v31 = vunpack.c.l.s8.bf16 %v1022_v42  ;;  %v1116_v32 = vunpack.c.l.s8.bf16 %v1024_v28 }
 0x1f6   : > { %v1118_v37 = vunpack.c.h.s8.bf16 %v1022_v42  ;;  %v1120_v38 = vunpack.c.h.s8.bf16 %v1024_v28 }
 0x1fc   : > { %1242 = vmatmul.mubr.bf16.gmra.mxu1 %v1069_v33  ;;  %1531 = vmatmul.mubr.bf16.gmra.mxu0 %v1071_v34  ;;  %v1021_v33 = vld [vmem:[%s3929_s23 + $0xe0] sm:$0xff]  ;;  %v1023_v34 = vld [vmem:[%s3929_s23 + $0xf0] sm:$0xff] }
 0x1fd   : > { %1249 = vmatprep.mubr.bf16.mxu1 %v1074_v35  ;;  %1538 = vmatprep.mubr.bf16.mxu0 %v1076_v36  ;;  %v1113_v35 = vunpack.c.l.s8.bf16 %v1021_v33  ;;  %v1115_v36 = vunpack.c.l.s8.bf16 %v1023_v34 }
 0x204   : > { %1250 = vmatmul.mubr.bf16.gmra.mxu1 %v1073_v39  ;;  %1539 = vmatmul.mubr.bf16.gmra.mxu0 %v1075_v43  ;;  %v1026_v39 = vld [vmem:[%s3929_s23 + $0x108] sm:$0xff]  ;;  %v1028_v43 = vld [vmem:[%s3929_s23 + $0x118] sm:$0xff] }
 0x205   : > { %1257 = vmatprep.mubr.bf16.mxu1 %v1078_v44  ;;  %1546 = vmatprep.mubr.bf16.mxu0 %v1080_v53  ;;  %v1117_v44 = vunpack.c.h.s8.bf16 %v1021_v33  ;;  %v1119_v53 = vunpack.c.h.s8.bf16 %v1023_v34  ;;  %v1122_v57 = vunpack.c.l.s8.bf16 %v1026_v39  ;;  %v1124_v54 = vunpack.c.l.s8.bf16 %v1028_v43 }
 0x206   : > { %v1126_v55 = vunpack.c.h.s8.bf16 %v1026_v39  ;;  %v1128_v59 = vunpack.c.h.s8.bf16 %v1028_v43  ;;  %v1046_v43 = vld [vmem:[%s3929_s23 + $0x1a8] sm:$0xff] }
 0x20c   : > { %1258 = vmatmul.mubr.bf16.gmra.mxu1 %v1077_v58  ;;  %1547 = vmatmul.mubr.bf16.gmra.mxu0 %v1079_v61  ;;  %v1025_v58 = vld [vmem:[%s3929_s23 + $0x100] sm:$0xff]  ;;  %v1027_v61 = vld [vmem:[%s3929_s23 + $0x110] sm:$0xff] }
 0x20d   : > { %1265 = vmatprep.mubr.bf16.mxu1 %v1082_v62  ;;  %1554 = vmatprep.mubr.bf16.mxu0 %v1084_v63  ;;  %v1121_v62 = vunpack.c.l.s8.bf16 %v1025_v58  ;;  %v1123_v63 = vunpack.c.l.s8.bf16 %v1027_v61 }
 0x214   : > { %1266 = vmatmul.mubr.bf16.gmra.mxu1 %v1081_v56  ;;  %1555 = vmatmul.mubr.bf16.gmra.mxu0 %v1083_v60  ;;  %v1030_v56 = vld [vmem:[%s3929_s23 + $0x128] sm:$0xff]  ;;  %v1032_v60 = vld [vmem:[%s3929_s23 + $0x138] sm:$0xff] }
 0x215   : > { %1273 = vmatprep.mubr.bf16.mxu1 %v1086_v0  ;;  %1562 = vmatprep.mubr.bf16.mxu0 %v1088_v1  ;;  %v1125_v0 = vunpack.c.h.s8.bf16 %v1025_v58  ;;  %v1127_v1 = vunpack.c.h.s8.bf16 %v1027_v61  ;;  %v1130_v45 = vunpack.c.l.s8.bf16 %v1030_v56  ;;  %v1132_v49 = vunpack.c.l.s8.bf16 %v1032_v60 }
 0x216   : > { %v1134_v4 = vunpack.c.h.s8.bf16 %v1030_v56  ;;  %v1136_v5 = vunpack.c.h.s8.bf16 %v1032_v60 }
 0x21c   : > { %1274 = vmatmul.mubr.bf16.gmra.mxu1 %v1085_v46  ;;  %1563 = vmatmul.mubr.bf16.gmra.mxu0 %v1087_v50  ;;  %v1029_v46 = vld [vmem:[%s3929_s23 + $0x120] sm:$0xff]  ;;  %v1031_v50 = vld [vmem:[%s3929_s23 + $0x130] sm:$0xff] }
 0x21d   : > { %1281 = vmatprep.mubr.bf16.mxu1 %v1090_v2  ;;  %1570 = vmatprep.mubr.bf16.mxu0 %v1092_v3  ;;  %v1129_v2 = vunpack.c.l.s8.bf16 %v1029_v46  ;;  %v1131_v3 = vunpack.c.l.s8.bf16 %v1031_v50 }
 0x224   : > { %1282 = vmatmul.mubr.bf16.gmra.mxu1 %v1089_v47  ;;  %1571 = vmatmul.mubr.bf16.gmra.mxu0 %v1091_v48  ;;  %v1034_v47 = vld [vmem:[%s3929_s23 + $0x148] sm:$0xff]  ;;  %v1036_v48 = vld [vmem:[%s3929_s23 + $0x158] sm:$0xff] }
 0x225   : > { %1289 = vmatprep.mubr.bf16.mxu1 %v1094_v51  ;;  %1578 = vmatprep.mubr.bf16.mxu0 %v1096_v52  ;;  %v1133_v51 = vunpack.c.h.s8.bf16 %v1029_v46  ;;  %v1135_v52 = vunpack.c.h.s8.bf16 %v1031_v50  ;;  %v1138_v6 = vunpack.c.l.s8.bf16 %v1034_v47  ;;  %v1140_v7 = vunpack.c.l.s8.bf16 %v1036_v48 }
 0x226   : > { %v1142_v12 = vunpack.c.h.s8.bf16 %v1034_v47  ;;  %v1144_v13 = vunpack.c.h.s8.bf16 %v1036_v48  ;;  %v1166_v47 = vunpack.c.h.s8.bf16 %v1046_v43 }
 0x22c   : > { %1290 = vmatmul.mubr.bf16.gmra.mxu1 %v1093_v8  ;;  %1579 = vmatmul.mubr.bf16.gmra.mxu0 %v1095_v9  ;;  %v1033_v8 = vld [vmem:[%s3929_s23 + $0x140] sm:$0xff]  ;;  %v1035_v9 = vld [vmem:[%s3929_s23 + $0x150] sm:$0xff] }
 0x22d   : > { %1297 = vmatprep.mubr.bf16.mxu1 %v1098_v10  ;;  %1586 = vmatprep.mubr.bf16.mxu0 %v1100_v11  ;;  %v1137_v10 = vunpack.c.l.s8.bf16 %v1033_v8  ;;  %v1139_v11 = vunpack.c.l.s8.bf16 %v1035_v9 }
 0x234   : > { %1298 = vmatmul.mubr.bf16.gmra.mxu1 %v1097_v14  ;;  %1587 = vmatmul.mubr.bf16.gmra.mxu0 %v1099_v17  ;;  %v1038_v14 = vld [vmem:[%s3929_s23 + $0x168] sm:$0xff]  ;;  %v1040_v17 = vld [vmem:[%s3929_s23 + $0x178] sm:$0xff] }
 0x235   : > { %1305 = vmatprep.mubr.bf16.mxu1 %v1102_v18  ;;  %1594 = vmatprep.mubr.bf16.mxu0 %v1104_v23  ;;  %v1141_v18 = vunpack.c.h.s8.bf16 %v1033_v8  ;;  %v1143_v23 = vunpack.c.h.s8.bf16 %v1035_v9  ;;  %v1146_v15 = vunpack.c.l.s8.bf16 %v1038_v14  ;;  %v1148_v21 = vunpack.c.l.s8.bf16 %v1040_v17 }
 0x236   : > { %v1150_v19 = vunpack.c.h.s8.bf16 %v1038_v14  ;;  %v1152_v25 = vunpack.c.h.s8.bf16 %v1040_v17 }
 0x23c   : > { %1306 = vmatmul.mubr.bf16.gmra.mxu1 %v1101_v16  ;;  %1595 = vmatmul.mubr.bf16.gmra.mxu0 %v1103_v22  ;;  %v1037_v16 = vld [vmem:[%s3929_s23 + $0x160] sm:$0xff]  ;;  %v1039_v22 = vld [vmem:[%s3929_s23 + $0x170] sm:$0xff] }
 0x23d   : > { %1313 = vmatprep.mubr.bf16.mxu1 %v1106_v40  ;;  %1602 = vmatprep.mubr.bf16.mxu0 %v1108_v24  ;;  %v1145_v40 = vunpack.c.l.s8.bf16 %v1037_v16  ;;  %v1147_v24 = vunpack.c.l.s8.bf16 %v1039_v22 }
 0x244   : > { %1314 = vmatmul.mubr.bf16.gmra.mxu1 %v1105_v27  ;;  %1603 = vmatmul.mubr.bf16.gmra.mxu0 %v1107_v20  ;;  %v1042_v27 = vld [vmem:[%s3929_s23 + $0x188] sm:$0xff]  ;;  %v1044_v20 = vld [vmem:[%s3929_s23 + $0x198] sm:$0xff] }
 0x245   : > { %1321 = vmatprep.mubr.bf16.mxu1 %v1110_v41  ;;  %1610 = vmatprep.mubr.bf16.mxu0 %v1112_v26  ;;  %v1149_v41 = vunpack.c.h.s8.bf16 %v1037_v16  ;;  %v1151_v26 = vunpack.c.h.s8.bf16 %v1039_v22  ;;  %v1154_v42 = vunpack.c.l.s8.bf16 %v1042_v27  ;;  %v1156_v28 = vunpack.c.l.s8.bf16 %v1044_v20 }
 0x246   : > { %v1158_v33 = vunpack.c.h.s8.bf16 %v1042_v27  ;;  %v1160_v34 = vunpack.c.h.s8.bf16 %v1044_v20  ;;  %v1051_v27 = vld [vmem:[%s3929_s23 + $0x1d0] sm:$0xff] }
 0x24c   : > { %1322 = vmatmul.mubr.bf16.gmra.mxu1 %v1109_v29  ;;  %1611 = vmatmul.mubr.bf16.gmra.mxu0 %v1111_v30  ;;  %v1041_v29 = vld [vmem:[%s3929_s23 + $0x180] sm:$0xff]  ;;  %v1043_v30 = vld [vmem:[%s3929_s23 + $0x190] sm:$0xff] }
 0x24d   : > { %1329 = vmatprep.mubr.bf16.mxu1 %v1114_v31  ;;  %1618 = vmatprep.mubr.bf16.mxu0 %v1116_v32  ;;  %v1153_v31 = vunpack.c.l.s8.bf16 %v1041_v29  ;;  %v1155_v32 = vunpack.c.l.s8.bf16 %v1043_v30  ;;  %v1159_v58 = vunpack.c.h.s8.bf16 %v1043_v30 }
 0x254   : > { %1330 = vmatmul.mubr.bf16.gmra.mxu1 %v1113_v35  ;;  %1619 = vmatmul.mubr.bf16.gmra.mxu0 %v1115_v36 }
 0x255   : > { %1337 = vmatprep.mubr.bf16.mxu1 %v1118_v37  ;;  %1626 = vmatprep.mubr.bf16.mxu0 %v1120_v38 }
 0x25c   : > { %1338 = vmatmul.mubr.bf16.gmra.mxu1 %v1117_v44  ;;  %1627 = vmatmul.mubr.bf16.gmra.mxu0 %v1119_v53  ;;  %v1048_v44 = vld [vmem:[%s3929_s23 + $0x1b8] sm:$0xff] }
 0x25d   : > { %1345 = vmatprep.mubr.bf16.mxu1 %v1122_v57  ;;  %1634 = vmatprep.mubr.bf16.mxu0 %v1124_v54  ;;  %v1157_v54 = vunpack.c.h.s8.bf16 %v1041_v29  ;;  %v1168_v48 = vunpack.c.h.s8.bf16 %v1048_v44  ;;  %v1171_v29 = vunpack.c.l.s8.bf16 %v1051_v27 }
 0x264   : > { %1346 = vmatmul.mubr.bf16.gmra.mxu1 %v1121_v62  ;;  %1635 = vmatmul.mubr.bf16.gmra.mxu0 %v1123_v63  ;;  %v1162_v62 = vunpack.c.l.s8.bf16 %v1046_v43  ;;  %v1164_v63 = vunpack.c.l.s8.bf16 %v1048_v44  ;;  %v1054_v44 = vld [vmem:[%s3929_s23 + $0x1e8] sm:$0xff] }
 0x265   : > { %1353 = vmatprep.mubr.bf16.mxu1 %v1126_v55  ;;  %1642 = vmatprep.mubr.bf16.mxu0 %v1128_v59 }
 0x26c   : > { %1354 = vmatmul.mubr.bf16.gmra.mxu1 %v1125_v0  ;;  %1643 = vmatmul.mubr.bf16.gmra.mxu0 %v1127_v1  ;;  %v1045_v1 = vld [vmem:[%s3929_s23 + $0x1a0] sm:$0xff] }
 0x26d   : > { %1361 = vmatprep.mubr.bf16.mxu1 %v1130_v45  ;;  %1650 = vmatprep.mubr.bf16.mxu0 %v1132_v49  ;;  %v1047_v45 = vld [vmem:[%s3929_s23 + $0x1b0] sm:$0xff]  ;;  %v1165_v17 = vunpack.c.h.s8.bf16 %v1045_v1 }
 0x274   : > { %1362 = vmatmul.mubr.bf16.gmra.mxu1 %v1129_v2  ;;  %1651 = vmatmul.mubr.bf16.gmra.mxu0 %v1131_v3  ;;  %v1161_v3 = vunpack.c.l.s8.bf16 %v1045_v1 }
 0x275   : > { %1369 = vmatprep.mubr.bf16.mxu1 %v1134_v4  ;;  %1658 = vmatprep.mubr.bf16.mxu0 %v1136_v5  ;;  %v1163_v4 = vunpack.c.l.s8.bf16 %v1047_v45 }
 0x27c   : > { %1370 = vmatmul.mubr.bf16.gmra.mxu1 %v1133_v51  ;;  %1659 = vmatmul.mubr.bf16.gmra.mxu0 %v1135_v52 }
 0x27d   : > { %1377 = vmatprep.mubr.bf16.mxu1 %v1138_v6  ;;  %1666 = vmatprep.mubr.bf16.mxu0 %v1140_v7 }
 0x284   : > { %1378 = vmatmul.mubr.bf16.gmra.mxu1 %v1137_v10  ;;  %1667 = vmatmul.mubr.bf16.gmra.mxu0 %v1139_v11  ;;  %v1050_v11 = vld [vmem:[%s3929_s23 + $0x1c8] sm:$0xff] }
 0x285   : > { %1385 = vmatprep.mubr.bf16.mxu1 %v1142_v12  ;;  %1674 = vmatprep.mubr.bf16.mxu0 %v1144_v13  ;;  %v1052_v12 = vld [vmem:[%s3929_s23 + $0x1d8] sm:$0xff] }
 0x28c   : > { %1386 = vmatmul.mubr.bf16.gmra.mxu1 %v1141_v18  ;;  %1675 = vmatmul.mubr.bf16.gmra.mxu0 %v1143_v23  ;;  %v1167_v18 = vunpack.c.h.s8.bf16 %v1047_v45 }
 0x28d   : > { %1393 = vmatprep.mubr.bf16.mxu1 %v1146_v15  ;;  %1682 = vmatprep.mubr.bf16.mxu0 %v1148_v21  ;;  %v1170_v15 = vunpack.c.l.s8.bf16 %v1050_v11  ;;  %v1172_v21 = vunpack.c.l.s8.bf16 %v1052_v12 }
 0x294   : > { %1394 = vmatmul.mubr.bf16.gmra.mxu1 %v1145_v40  ;;  %1683 = vmatmul.mubr.bf16.gmra.mxu0 %v1147_v24 }
 0x295   : > { %1401 = vmatprep.mubr.bf16.mxu1 %v1150_v19  ;;  %1690 = vmatprep.mubr.bf16.mxu0 %v1152_v25  ;;  %v1049_v25 = vld [vmem:[%s3929_s23 + $0x1c0] sm:$0xff] }
 0x29c   : > { %1402 = vmatmul.mubr.bf16.gmra.mxu1 %v1149_v41  ;;  %1691 = vmatmul.mubr.bf16.gmra.mxu0 %v1151_v26 }
 0x29d   : > { %1409 = vmatprep.mubr.bf16.mxu1 %v1154_v42  ;;  %1698 = vmatprep.mubr.bf16.mxu0 %v1156_v28  ;;  %v1169_v28 = vunpack.c.l.s8.bf16 %v1049_v25 }
 0x2a4   : > { %v1219_v35 = vpop.f32.mrf.mxu1  ;;  %1410 = vmatmul.mubr.bf16.gmra.mxu1 %v1153_v31  ;;  %v1508_v36 = vpop.f32.mrf.mxu0  ;;  %1699 = vmatmul.mubr.bf16.gmra.mxu0 %v1155_v32  ;;  %v1174_v31 = vunpack.c.h.s8.bf16 %v1050_v11  ;;  %v1176_v32 = vunpack.c.h.s8.bf16 %v1052_v12 }
 0x2a5   : > { %v4172_v37 = vadd.f32 %v1508_v36, %v1219_v35  ;;  %1417 = vmatprep.mubr.bf16.mxu1 %v1158_v33  ;;  %1706 = vmatprep.mubr.bf16.mxu0 %v1160_v34 }
 0x2a6   : > { %v1221_v38 = vpop.f32.mrf.mxu1  ;;  %v1510_v39 = vpop.f32.mrf.mxu0 }
 0x2a8   : > { %v1222_v53 = vpop.f32.mrf.mxu1  ;;  %v1511_v57 = vpop.f32.mrf.mxu0 }
 0x2a9   : > { %v4176_v61 = vadd.f32 %v1511_v57, %v1222_v53  ;;  %v1056_v53 = vld [vmem:[%s3929_s23 + $0x1f8] sm:$0xff] }
 0x2aa   : > { %v1224_v55 = vpop.f32.mrf.mxu1  ;;  %v1513_v59 = vpop.f32.mrf.mxu0 }
 0x2ab   : > { %v1178_v55 = vunpack.c.l.s8.bf16 %v1054_v44  ;;  %v1180_v59 = vunpack.c.l.s8.bf16 %v1056_v53 }
 0x2ac   : > { %v1227_v56 = vpop.f32.mrf.mxu1  ;;  %1418 = vmatmul.mubr.bf16.gmra.mxu1 %v1157_v54  ;;  %v1516_v60 = vpop.f32.mrf.mxu0  ;;  %1707 = vmatmul.mubr.bf16.gmra.mxu0 %v1159_v58  ;;  %v1173_v58 = vunpack.c.h.s8.bf16 %v1049_v25 }
 0x2ad   : > { %v4178_v0 = vadd.f32 %v1516_v60, %v1227_v56  ;;  %1425 = vmatprep.mubr.bf16.mxu1 %v1162_v62  ;;  %1714 = vmatprep.mubr.bf16.mxu0 %v1164_v63  ;;  %v1175_v62 = vunpack.c.h.s8.bf16 %v1051_v27 }
 0x2ae   : > { %v1229_v49 = vpop.f32.mrf.mxu1  ;;  %v1518_v46 = vpop.f32.mrf.mxu0 }
 0x2af   : > { %v1053_v46 = vld [vmem:[%s3929_s23 + $0x1e0] sm:$0xff] }
 0x2b0   : > { %v1230_v50 = vpop.f32.mrf.mxu1  ;;  %v1519_v2 = vpop.f32.mrf.mxu0 }
 0x2b1   : > { %v4182_v5 = vadd.f32 %v1519_v2, %v1230_v50  ;;  %v1055_v50 = vld [vmem:[%s3929_s23 + $0x1f0] sm:$0xff] }
 0x2b2   : > { %v1232_v51 = vpop.f32.mrf.mxu1  ;;  %v1521_v52 = vpop.f32.mrf.mxu0 }
 0x2b3   : > { %v1179_v51 = vunpack.c.l.s8.bf16 %v1055_v50 }
 0x2b4   : > { %v1235_v6 = vpop.f32.mrf.mxu1  ;;  %1426 = vmatmul.mubr.bf16.gmra.mxu1 %v1161_v3  ;;  %v1524_v7 = vpop.f32.mrf.mxu0  ;;  %1715 = vmatmul.mubr.bf16.gmra.mxu0 %v1163_v4 }
 0x2b5   : > { %v4184_v8 = vadd.f32 %v1524_v7, %v1235_v6  ;;  %1433 = vmatprep.mubr.bf16.mxu1 %v1166_v47  ;;  %1722 = vmatprep.mubr.bf16.mxu0 %v1168_v48  ;;  %v1177_v48 = vunpack.c.l.s8.bf16 %v1053_v46  ;;  %v1182_v6 = vunpack.c.h.s8.bf16 %v1054_v44  ;;  %v1184_v7 = vunpack.c.h.s8.bf16 %v1056_v53 }
 0x2b6   : > { %v1237_v9 = vpop.f32.mrf.mxu1  ;;  %v1526_v10 = vpop.f32.mrf.mxu0 }
 0x2b8   : > { %v1238_v13 = vpop.f32.mrf.mxu1  ;;  %v1527_v14 = vpop.f32.mrf.mxu0 }
 0x2b9   : > { %v4188_v23 = vadd.f32 %v1527_v14, %v1238_v13 }
 0x2ba   : > { %v1240_v16 = vpop.f32.mrf.mxu1  ;;  %v1529_v22 = vpop.f32.mrf.mxu0 }
 0x2bb   : > { %v1183_v16 = vunpack.c.h.s8.bf16 %v1055_v50 }
 0x2bc   : > { %v1243_v40 = vpop.f32.mrf.mxu1  ;;  %1434 = vmatmul.mubr.bf16.gmra.mxu1 %v1165_v17  ;;  %v1532_v24 = vpop.f32.mrf.mxu0  ;;  %1723 = vmatmul.mubr.bf16.gmra.mxu0 %v1167_v18 }
 0x2bd   : > { %v4190_v19 = vadd.f32 %v1532_v24, %v1243_v40  ;;  %1441 = vmatprep.mubr.bf16.mxu1 %v1170_v15  ;;  %1730 = vmatprep.mubr.bf16.mxu0 %v1172_v21  ;;  %v1181_v21 = vunpack.c.h.s8.bf16 %v1053_v46 }
 0x2be   : > { %v1245_v20 = vpop.f32.mrf.mxu1  ;;  %v1534_v41 = vpop.f32.mrf.mxu0 }
 0x2c0   : > { %v1246_v26 = vpop.f32.mrf.mxu1  ;;  %v1535_v42 = vpop.f32.mrf.mxu0 }
 0x2c1   : > { %v4194_v30 = vadd.f32 %v1535_v42, %v1246_v26 }
 0x2c2   : > { %v1248_v33 = vpop.f32.mrf.mxu1  ;;  %v1537_v34 = vpop.f32.mrf.mxu0 }
 0x2c4   : > { %v1251_v35 = vpop.f32.mrf.mxu1  ;;  %1442 = vmatmul.mubr.bf16.gmra.mxu1 %v1169_v28  ;;  %v1540_v36 = vpop.f32.mrf.mxu0  ;;  %1731 = vmatmul.mubr.bf16.gmra.mxu0 %v1171_v29 }
 0x2c5   : > { %v4196_v38 = vadd.f32 %v1540_v36, %v1251_v35  ;;  %1449 = vmatprep.mubr.bf16.mxu1 %v1174_v31  ;;  %1738 = vmatprep.mubr.bf16.mxu0 %v1176_v32 }
 0x2c6   : > { %v1253_v39 = vpop.f32.mrf.mxu1  ;;  %v1542_v43 = vpop.f32.mrf.mxu0 }
 0x2c8   : > { %v1254_v57 = vpop.f32.mrf.mxu1  ;;  %v1543_v54 = vpop.f32.mrf.mxu0 }
 0x2c9   : > { %v4200_v63 = vadd.f32 %v1543_v54, %v1254_v57 }
 0x2ca   : > { %v1256_v56 = vpop.f32.mrf.mxu1  ;;  %v1545_v60 = vpop.f32.mrf.mxu0 }
 0x2cc   : > { %v1259_v1 = vpop.f32.mrf.mxu1  ;;  %1450 = vmatmul.mubr.bf16.gmra.mxu1 %v1173_v58  ;;  %v1548_v45 = vpop.f32.mrf.mxu0  ;;  %1739 = vmatmul.mubr.bf16.gmra.mxu0 %v1175_v62 }
 0x2cd   : > { %v4202_v49 = vadd.f32 %v1548_v45, %v1259_v1  ;;  %1457 = vmatprep.mubr.bf16.mxu1 %v1178_v55  ;;  %1746 = vmatprep.mubr.bf16.mxu0 %v1180_v59 }
 0x2ce   : > { %v1261_v2 = vpop.f32.mrf.mxu1  ;;  %v1550_v3 = vpop.f32.mrf.mxu0 }
 0x2d0   : > { %v1262_v4 = vpop.f32.mrf.mxu1  ;;  %v1551_v47 = vpop.f32.mrf.mxu0 }
 0x2d1   : > { %v4206_v52 = vadd.f32 %v1551_v47, %v1262_v4 }
 0x2d2   : > { %v1264_v9 = vpop.f32.mrf.mxu1  ;;  %v1553_v10 = vpop.f32.mrf.mxu0 }
 0x2d4   : > { %v1267_v11 = vpop.f32.mrf.mxu1  ;;  %1458 = vmatmul.mubr.bf16.gmra.mxu1 %v1177_v48  ;;  %v1556_v12 = vpop.f32.mrf.mxu0  ;;  %1747 = vmatmul.mubr.bf16.gmra.mxu0 %v1179_v51 }
 0x2d5   : > { %v4208_v13 = vadd.f32 %v1556_v12, %v1267_v11  ;;  %1465 = vmatprep.mubr.bf16.mxu1 %v1182_v6  ;;  %1754 = vmatprep.mubr.bf16.mxu0 %v1184_v7 }
 0x2d6   : > { %v1269_v14 = vpop.f32.mrf.mxu1  ;;  %v1558_v17 = vpop.f32.mrf.mxu0 }
 0x2d8   : > { %v1270_v18 = vpop.f32.mrf.mxu1  ;;  %v1559_v15 = vpop.f32.mrf.mxu0 }
 0x2d9   : > { %v4210_v22 = vadd.f32 %v1559_v15, %v1270_v18 }
 0x2da   : > { %v1272_v40 = vpop.f32.mrf.mxu1  ;;  %v1561_v24 = vpop.f32.mrf.mxu0 }
 0x2dc   : > { %v1275_v25 = vpop.f32.mrf.mxu1  ;;  %1466 = vmatmul.mubr.bf16.gmra.mxu1 %v1181_v21  ;;  %v1564_v27 = vpop.f32.mrf.mxu0  ;;  %1755 = vmatmul.mubr.bf16.gmra.mxu0 %v1183_v16 }
 0x2dd   : > { %v4212_v20 = vadd.f32 %v1564_v27, %v1275_v25 }
 0x2de   : > { %v1277_v41 = vpop.f32.mrf.mxu1  ;;  %v1566_v26 = vpop.f32.mrf.mxu0 }
 0x2e0   : > { %v1278_v42 = vpop.f32.mrf.mxu1  ;;  %v1567_v28 = vpop.f32.mrf.mxu0 }
 0x2e1   : > { %v4214_v29 = vadd.f32 %v1567_v28, %v1278_v42 }
 0x2e2   : > { %v1280_v31 = vpop.f32.mrf.mxu1  ;;  %v1569_v32 = vpop.f32.mrf.mxu0 }
 0x2e4   : > { %v1283_v33 = vpop.f32.mrf.mxu1  ;;  %v1572_v34 = vpop.f32.mrf.mxu0 }
 0x2e5   : > { %v4216_v35 = vadd.f32 %v1572_v34, %v1283_v33 }
 0x2e6   : > { %v1285_v36 = vpop.f32.mrf.mxu1  ;;  %v1574_v39 = vpop.f32.mrf.mxu0 }
 0x2e8   : > { %v1286_v43 = vpop.f32.mrf.mxu1  ;;  %v1575_v44 = vpop.f32.mrf.mxu0 }
 0x2e9   : > { %v4218_v53 = vadd.f32 %v1575_v44, %v1286_v43 }
 0x2ea   : > { %v1288_v57 = vpop.f32.mrf.mxu1  ;;  %v1577_v54 = vpop.f32.mrf.mxu0 }
 0x2ec   : > { %v1291_v58 = vpop.f32.mrf.mxu1  ;;  %v1580_v62 = vpop.f32.mrf.mxu0 }
 0x2ed   : > { %v4220_v55 = vadd.f32 %v1580_v62, %v1291_v58 }
 0x2ee   : > { %v1293_v59 = vpop.f32.mrf.mxu1  ;;  %v1582_v56 = vpop.f32.mrf.mxu0 }
 0x2f0   : > { %v1294_v60 = vpop.f32.mrf.mxu1  ;;  %v1583_v1 = vpop.f32.mrf.mxu0 }
 0x2f1   : > { %v4222_v45 = vadd.f32 %v1583_v1, %v1294_v60 }
 0x2f2   : > { %v1296_v46 = vpop.f32.mrf.mxu1  ;;  %v1585_v50 = vpop.f32.mrf.mxu0 }
 0x2f4   : > { %v1299_v2 = vpop.f32.mrf.mxu1  ;;  %v1588_v3 = vpop.f32.mrf.mxu0 }
 0x2f5   : > { %v4224_v4 = vadd.f32 %v1588_v3, %v1299_v2 }
 0x2f6   : > { %v1301_v47 = vpop.f32.mrf.mxu1  ;;  %v1590_v48 = vpop.f32.mrf.mxu0 }
 0x2f8   : > { %v1302_v51 = vpop.f32.mrf.mxu1  ;;  %v1591_v6 = vpop.f32.mrf.mxu0 }
 0x2f9   : > { %v4226_v7 = vadd.f32 %v1591_v6, %v1302_v51 }
 0x2fa   : > { %v1304_v9 = vpop.f32.mrf.mxu1  ;;  %v1593_v10 = vpop.f32.mrf.mxu0 }
 0x2fc   : > { %v1307_v11 = vpop.f32.mrf.mxu1  ;;  %v1596_v12 = vpop.f32.mrf.mxu0 }
 0x2fd   : > { %v4228_v14 = vadd.f32 %v1596_v12, %v1307_v11 }
 0x2fe   : > { %v1309_v17 = vpop.f32.mrf.mxu1  ;;  %v1598_v18 = vpop.f32.mrf.mxu0 }
 0x300   : > { %v1310_v15 = vpop.f32.mrf.mxu1  ;;  %v1599_v21 = vpop.f32.mrf.mxu0 }
 0x301   : > { %v4230_v16 = vadd.f32 %v1599_v21, %v1310_v15 }
 0x302   : > { %v1312_v40 = vpop.f32.mrf.mxu1  ;;  %v1601_v24 = vpop.f32.mrf.mxu0 }
 0x304   : > { %v1315_v25 = vpop.f32.mrf.mxu1  ;;  %v1604_v27 = vpop.f32.mrf.mxu0 }
 0x305   : > { %v4232_v41 = vadd.f32 %v1604_v27, %v1315_v25 }
 0x306   : > { %v1317_v26 = vpop.f32.mrf.mxu1  ;;  %v1606_v42 = vpop.f32.mrf.mxu0 }
 0x308   : > { %v1318_v28 = vpop.f32.mrf.mxu1  ;;  %v1607_v31 = vpop.f32.mrf.mxu0 }
 0x309   : > { %v4234_v32 = vadd.f32 %v1607_v31, %v1318_v28 }
 0x30a   : > { %v1320_v33 = vpop.f32.mrf.mxu1  ;;  %v1609_v34 = vpop.f32.mrf.mxu0 }
 0x30c   : > { %v1323_v36 = vpop.f32.mrf.mxu1  ;;  %v1612_v39 = vpop.f32.mrf.mxu0 }
 0x30d   : > { %v4236_v43 = vadd.f32 %v1612_v39, %v1323_v36 }
 0x30e   : > { %v1325_v44 = vpop.f32.mrf.mxu1  ;;  %v1614_v57 = vpop.f32.mrf.mxu0 }
 0x310   : > { %v1326_v54 = vpop.f32.mrf.mxu1  ;;  %v1615_v58 = vpop.f32.mrf.mxu0 }
 0x311   : > { %v4238_v62 = vadd.f32 %v1615_v58, %v1326_v54 }
 0x312   : > { %v1328_v59 = vpop.f32.mrf.mxu1  ;;  %v1617_v56 = vpop.f32.mrf.mxu0 }
 0x314   : > { %v1331_v60 = vpop.f32.mrf.mxu1  ;;  %v1620_v1 = vpop.f32.mrf.mxu0 }
 0x315   : > { %v4240_v46 = vadd.f32 %v1620_v1, %v1331_v60 }
 0x316   : > { %v1333_v50 = vpop.f32.mrf.mxu1  ;;  %v1622_v2 = vpop.f32.mrf.mxu0 }
 0x318   : > { %v1334_v3 = vpop.f32.mrf.mxu1  ;;  %v1623_v47 = vpop.f32.mrf.mxu0 }
 0x319   : > { %v4242_v48 = vadd.f32 %v1623_v47, %v1334_v3 }
 0x31a   : > { %v1336_v51 = vpop.f32.mrf.mxu1  ;;  %v1625_v6 = vpop.f32.mrf.mxu0 }
 0x31c   : > { %v1339_v9 = vpop.f32.mrf.mxu1  ;;  %v1628_v10 = vpop.f32.mrf.mxu0 }
 0x31d   : > { %v4244_v11 = vadd.f32 %v1628_v10, %v1339_v9 }
 0x31e   : > { %v1341_v12 = vpop.f32.mrf.mxu1  ;;  %v1630_v17 = vpop.f32.mrf.mxu0 }
 0x320   : > { %v1342_v18 = vpop.f32.mrf.mxu1  ;;  %v1631_v15 = vpop.f32.mrf.mxu0 }
 0x321   : > { %v4246_v21 = vadd.f32 %v1631_v15, %v1342_v18 }
 0x322   : > { %v1344_v40 = vpop.f32.mrf.mxu1  ;;  %v1633_v24 = vpop.f32.mrf.mxu0 }
 0x324   : > { %v1347_v25 = vpop.f32.mrf.mxu1  ;;  %v1636_v27 = vpop.f32.mrf.mxu0 }
 0x325   : > { %v4248_v26 = vadd.f32 %v1636_v27, %v1347_v25 }
 0x326   : > { %v1349_v42 = vpop.f32.mrf.mxu1  ;;  %v1638_v28 = vpop.f32.mrf.mxu0 }
 0x328   : > { %v1350_v31 = vpop.f32.mrf.mxu1  ;;  %v1639_v33 = vpop.f32.mrf.mxu0 }
 0x329   : > { %v4250_v34 = vadd.f32 %v1639_v33, %v1350_v31 }
 0x32a   : > { %v1352_v36 = vpop.f32.mrf.mxu1  ;;  %v1641_v39 = vpop.f32.mrf.mxu0 }
 0x32c   : > { %v1355_v44 = vpop.f32.mrf.mxu1  ;;  %v1644_v57 = vpop.f32.mrf.mxu0 }
 0x32d   : > { %v4252_v54 = vadd.f32 %v1644_v57, %v1355_v44 }
 0x32e   : > { %v1357_v58 = vpop.f32.mrf.mxu1  ;;  %v1646_v59 = vpop.f32.mrf.mxu0 }
 0x330   : > { %v1358_v56 = vpop.f32.mrf.mxu1  ;;  %v1647_v60 = vpop.f32.mrf.mxu0 }
 0x331   : > { %v4254_v1 = vadd.f32 %v1647_v60, %v1358_v56 }
 0x332   : > { %v1360_v50 = vpop.f32.mrf.mxu1  ;;  %v1649_v2 = vpop.f32.mrf.mxu0 }
 0x334   : > { %v1363_v3 = vpop.f32.mrf.mxu1  ;;  %v1652_v47 = vpop.f32.mrf.mxu0 }
 0x335   : > { %v4256_v51 = vadd.f32 %v1652_v47, %v1363_v3 }
 0x336   : > { %v1365_v6 = vpop.f32.mrf.mxu1  ;;  %v1654_v9 = vpop.f32.mrf.mxu0 }
 0x338   : > { %v1366_v10 = vpop.f32.mrf.mxu1  ;;  %v1655_v12 = vpop.f32.mrf.mxu0 }
 0x339   : > { %v4258_v17 = vadd.f32 %v1655_v12, %v1366_v10 }
 0x33a   : > { %v1368_v18 = vpop.f32.mrf.mxu1  ;;  %v1657_v15 = vpop.f32.mrf.mxu0 }
 0x33c   : > { %v1371_v40 = vpop.f32.mrf.mxu1  ;;  %v1660_v24 = vpop.f32.mrf.mxu0 }
 0x33d   : > { %v4260_v25 = vadd.f32 %v1660_v24, %v1371_v40 }
 0x33e   : > { %v1373_v27 = vpop.f32.mrf.mxu1  ;;  %v1662_v42 = vpop.f32.mrf.mxu0 }
 0x340   : > { %v1374_v28 = vpop.f32.mrf.mxu1  ;;  %v1663_v31 = vpop.f32.mrf.mxu0 }
 0x341   : > { %v4262_v33 = vadd.f32 %v1663_v31, %v1374_v28 }
 0x342   : > { %v1376_v36 = vpop.f32.mrf.mxu1  ;;  %v1665_v39 = vpop.f32.mrf.mxu0 }
 0x344   : > { %v1379_v44 = vpop.f32.mrf.mxu1  ;;  %v1668_v57 = vpop.f32.mrf.mxu0 }
 0x345   : > { %v4264_v58 = vadd.f32 %v1668_v57, %v1379_v44 }
 0x346   : > { %v1381_v59 = vpop.f32.mrf.mxu1  ;;  %v1670_v56 = vpop.f32.mrf.mxu0 }
 0x348   : > { %v1382_v60 = vpop.f32.mrf.mxu1  ;;  %v1671_v50 = vpop.f32.mrf.mxu0 }
 0x349   : > { %v4266_v2 = vadd.f32 %v1671_v50, %v1382_v60 }
 0x34a   : > { %v1384_v3 = vpop.f32.mrf.mxu1  ;;  %v1673_v47 = vpop.f32.mrf.mxu0 }
 0x34c   : > { %v1387_v6 = vpop.f32.mrf.mxu1  ;;  %v1676_v9 = vpop.f32.mrf.mxu0 }
 0x34d   : > { %v4268_v10 = vadd.f32 %v1676_v9, %v1387_v6 }
 0x34e   : > { %v1389_v12 = vpop.f32.mrf.mxu1  ;;  %v1678_v18 = vpop.f32.mrf.mxu0 }
 0x350   : > { %v1390_v15 = vpop.f32.mrf.mxu1  ;;  %v1679_v40 = vpop.f32.mrf.mxu0 }
 0x351   : > { %v4270_v24 = vadd.f32 %v1679_v40, %v1390_v15 }
 0x352   : > { %v1392_v27 = vpop.f32.mrf.mxu1  ;;  %v1681_v42 = vpop.f32.mrf.mxu0 }
 0x354   : > { %v1395_v28 = vpop.f32.mrf.mxu1  ;;  %v1684_v31 = vpop.f32.mrf.mxu0 }
 0x355   : > { %v4272_v36 = vadd.f32 %v1684_v31, %v1395_v28 }
 0x356   : > { %v1397_v39 = vpop.f32.mrf.mxu1  ;;  %v1686_v44 = vpop.f32.mrf.mxu0 }
 0x358   : > { %v1398_v57 = vpop.f32.mrf.mxu1  ;;  %v1687_v59 = vpop.f32.mrf.mxu0 }
 0x359   : > { %v4274_v56 = vadd.f32 %v1687_v59, %v1398_v57 }
 0x35a   : > { %v1400_v60 = vpop.f32.mrf.mxu1  ;;  %v1689_v50 = vpop.f32.mrf.mxu0 }
 0x35c   : > { %v1403_v3 = vpop.f32.mrf.mxu1  ;;  %v1692_v47 = vpop.f32.mrf.mxu0 }
 0x35d   : > { %v4276_v6 = vadd.f32 %v1692_v47, %v1403_v3 }
 0x35e   : > { %v1405_v9 = vpop.f32.mrf.mxu1  ;;  %v1694_v12 = vpop.f32.mrf.mxu0 }
 0x35f   : > { %4606 = vst [vmem:[#allocation24_spill] sm:$0xff] %v4276_v6 }
 0x360   : > { %v1406_v18 = vpop.f32.mrf.mxu1  ;;  %v1695_v15 = vpop.f32.mrf.mxu0 }
 0x361   : > { %v4278_v40 = vadd.f32 %v1695_v15, %v1406_v18 }
 0x362   : > { %v1408_v27 = vpop.f32.mrf.mxu1  ;;  %v1697_v42 = vpop.f32.mrf.mxu0 }
 0x363   : > { %4607 = vst [vmem:[#allocation25_spill] sm:$0xff] %v4278_v40 }
 0x364   : > { %v1411_v28 = vpop.f32.mrf.mxu1  ;;  %v1700_v31 = vpop.f32.mrf.mxu0 }
 0x365   : > { %v4280_v39 = vadd.f32 %v1700_v31, %v1411_v28 }
 0x366   : > { %v1413_v44 = vpop.f32.mrf.mxu1  ;;  %v1702_v57 = vpop.f32.mrf.mxu0 }
 0x367   : > { %4608 = vst [vmem:[#allocation26_spill] sm:$0xff] %v4280_v39 }
 0x368   : > { %v1414_v59 = vpop.f32.mrf.mxu1  ;;  %v1703_v60 = vpop.f32.mrf.mxu0 }
 0x369   : > { %v4282_v50 = vadd.f32 %v1703_v60, %v1414_v59 }
 0x36a   : > { %v1416_v3 = vpop.f32.mrf.mxu1  ;;  %v1705_v47 = vpop.f32.mrf.mxu0 }
 0x36b   : > { %4609 = vst [vmem:[#allocation27_spill] sm:$0xff] %v4282_v50 }
 0x36c   : > { %v1419_v9 = vpop.f32.mrf.mxu1  ;;  %v1708_v12 = vpop.f32.mrf.mxu0 }
 0x36d   : > { %v4284_v6 = vadd.f32 %v1708_v12, %v1419_v9 }
 0x36e   : > { %v1421_v18 = vpop.f32.mrf.mxu1  ;;  %v1710_v15 = vpop.f32.mrf.mxu0 }
 0x36f   : > { %4610 = vst [vmem:[#allocation28_spill] sm:$0xff] %v4284_v6 }
 0x370   : > { %v1422_v27 = vpop.f32.mrf.mxu1  ;;  %v1711_v42 = vpop.f32.mrf.mxu0 }
 0x371   : > { %v4286_v40 = vadd.f32 %v1711_v42, %v1422_v27 }
 0x372   : > { %v1424_v28 = vpop.f32.mrf.mxu1  ;;  %v1713_v31 = vpop.f32.mrf.mxu0 }
 0x373   : > { %4611 = vst [vmem:[#allocation29_spill] sm:$0xff] %v4286_v40 }
 0x374   : > { %v1427_v44 = vpop.f32.mrf.mxu1  ;;  %v1716_v57 = vpop.f32.mrf.mxu0 }
 0x375   : > { %v4288_v39 = vadd.f32 %v1716_v57, %v1427_v44 }
 0x376   : > { %v1429_v59 = vpop.f32.mrf.mxu1  ;;  %v1718_v60 = vpop.f32.mrf.mxu0 }
 0x377   : > { %4612 = vst [vmem:[#allocation30_spill] sm:$0xff] %v4288_v39 }
 0x378   : > { %v1430_v3 = vpop.f32.mrf.mxu1  ;;  %v1719_v47 = vpop.f32.mrf.mxu0 }
 0x379   : > { %v4290_v50 = vadd.f32 %v1719_v47, %v1430_v3 }
 0x37a   : > { %v1432_v9 = vpop.f32.mrf.mxu1  ;;  %v1721_v12 = vpop.f32.mrf.mxu0 }
 0x37b   : > { %4613 = vst [vmem:[#allocation31_spill] sm:$0xff] %v4290_v50 }
 0x37c   : > { %v1435_v18 = vpop.f32.mrf.mxu1  ;;  %v1724_v15 = vpop.f32.mrf.mxu0 }
 0x37d   : > { %v4292_v6 = vadd.f32 %v1724_v15, %v1435_v18 }
 0x37e   : > { %v1437_v27 = vpop.f32.mrf.mxu1  ;;  %v1726_v42 = vpop.f32.mrf.mxu0 }
 0x37f   : > { %4614 = vst [vmem:[#allocation32_spill] sm:$0xff] %v4292_v6 }
 0x380   : > { %v1438_v28 = vpop.f32.mrf.mxu1  ;;  %v1727_v31 = vpop.f32.mrf.mxu0 }
 0x381   : > { %v4294_v40 = vadd.f32 %v1727_v31, %v1438_v28 }
 0x382   : > { %v1440_v44 = vpop.f32.mrf.mxu1  ;;  %v1729_v57 = vpop.f32.mrf.mxu0 }
 0x383   : > { %4615 = vst [vmem:[#allocation33_spill] sm:$0xff] %v4294_v40 }
 0x384   : > { %v1443_v59 = vpop.f32.mrf.mxu1  ;;  %v1732_v60 = vpop.f32.mrf.mxu0 }
 0x385   : > { %v4296_v39 = vadd.f32 %v1732_v60, %v1443_v59 }
 0x386   : > { %v1445_v3 = vpop.f32.mrf.mxu1  ;;  %v1734_v47 = vpop.f32.mrf.mxu0 }
 0x387   : > { %4616 = vst [vmem:[#allocation34_spill] sm:$0xff] %v4296_v39 }
 0x388   : > { %v1446_v9 = vpop.f32.mrf.mxu1  ;;  %v1735_v12 = vpop.f32.mrf.mxu0 }
 0x389   : > { %v4298_v50 = vadd.f32 %v1735_v12, %v1446_v9 }
 0x38a   : > { %v1448_v18 = vpop.f32.mrf.mxu1  ;;  %v1737_v15 = vpop.f32.mrf.mxu0 }
 0x38b   : > { %4617 = vst [vmem:[#allocation35_spill] sm:$0xff] %v4298_v50 }
 0x38c   : > { %v1451_v27 = vpop.f32.mrf.mxu1  ;;  %v1740_v42 = vpop.f32.mrf.mxu0 }
 0x38d   : > { %v4300_v6 = vadd.f32 %v1740_v42, %v1451_v27 }
 0x38e   : > { %v1453_v28 = vpop.f32.mrf.mxu1  ;;  %v1742_v31 = vpop.f32.mrf.mxu0 }
 0x38f   : > { %4618 = vst [vmem:[#allocation36_spill] sm:$0xff] %v4300_v6 }
 0x390   : > { %v1454_v44 = vpop.f32.mrf.mxu1  ;;  %v1743_v57 = vpop.f32.mrf.mxu0 }
 0x391   : > { %v4302_v40 = vadd.f32 %v1743_v57, %v1454_v44 }
 0x392   : > { %v1456_v59 = vpop.f32.mrf.mxu1  ;;  %v1745_v60 = vpop.f32.mrf.mxu0 }
 0x393   : > { %4619 = vst [vmem:[#allocation37_spill] sm:$0xff] %v4302_v40 }
 0x394   : > { %v1459_v3 = vpop.f32.mrf.mxu1  ;;  %v1748_v47 = vpop.f32.mrf.mxu0 }
 0x395   : > { %v4304_v39 = vadd.f32 %v1748_v47, %v1459_v3 }
 0x396   : > { %v1461_v9 = vpop.f32.mrf.mxu1  ;;  %v1750_v12 = vpop.f32.mrf.mxu0 }
 0x398   : > { %v1462_v18 = vpop.f32.mrf.mxu1  ;;  %v1751_v15 = vpop.f32.mrf.mxu0 }
 0x399   : > { %v4306_v50 = vadd.f32 %v1751_v15, %v1462_v18 }
 0x39a   : > { %v1464_v27 = vpop.f32.mrf.mxu1  ;;  %v1753_v42 = vpop.f32.mrf.mxu0 }
 0x39c   : > { %v1467_v28 = vpop.f32.mrf.mxu1  ;;  %v1756_v31 = vpop.f32.mrf.mxu0 }
 0x39d   : > { %v4308_v6 = vadd.f32 %v1756_v31, %v1467_v28 }
 0x39e   : > { %v1469_v44 = vpop.f32.mrf.mxu1  ;;  %v1758_v57 = vpop.f32.mrf.mxu0 }
 0x39f   : > { %1766 = sbr.rel (%p2746_p3) target bundleno = 964 (0x3c4), region = 52 }
 0x3a0   : > { %v1470_v59 = vpop.f32.mrf.mxu1  ;;  %v1759_v60 = vpop.f32.mrf.mxu0 }
 0x3a1   : > { %v4310_v40 = vadd.f32 %v1759_v60, %v1470_v59 }
 0x3a2   : > { %v1472_v3 = vpop.f32.mrf.mxu1  ;;  %v1761_v47 = vpop.f32.mrf.mxu0 }
 0x3a3   : > { %4620 = vst [vmem:[#allocation38_spill] sm:$0xff] %v4310_v40 }
 0x3a4   : > { %1767 = vst [vmem:[#allocation2 + $0xb0] sm:$0xff] %v4172_v37  ;;  %1768 = vst [vmem:[#allocation2 + $0x1b0] sm:$0xff] %v4176_v61  ;;  %v4621_v9 = vld [vmem:[#allocation24_spill] sm:$0xff]  ;;  %v4622_v12 = vld [vmem:[#allocation25_spill] sm:$0xff] }
 0x3a5   : > { %1769 = vst [vmem:[#allocation2 + $0xd8] sm:$0xff] %v4178_v0  ;;  %1770 = vst [vmem:[#allocation2 + $0x18] sm:$0xff] %v4182_v5  ;;  %v4623_v18 = vld [vmem:[#allocation26_spill] sm:$0xff]  ;;  %v4624_v15 = vld [vmem:[#allocation27_spill] sm:$0xff] }
 0x3a6   : > { %1771 = vst [vmem:[#allocation2 + $0x50] sm:$0xff] %v4184_v8  ;;  %1772 = vst [vmem:[#allocation2 + $0x168] sm:$0xff] %v4188_v23  ;;  %v4625_v27 = vld [vmem:[#allocation28_spill] sm:$0xff]  ;;  %v4626_v42 = vld [vmem:[#allocation29_spill] sm:$0xff] }
 0x3a7   : > { %1773 = vst [vmem:[#allocation2 + $0x130] sm:$0xff] %v4190_v19  ;;  %1774 = vst [vmem:[#allocation2 + $0x48] sm:$0xff] %v4194_v30  ;;  %v4627_v28 = vld [vmem:[#allocation30_spill] sm:$0xff]  ;;  %v4628_v31 = vld [vmem:[#allocation31_spill] sm:$0xff] }
 0x3a8   : > { %1775 = vst [vmem:[#allocation2 + $0x180] sm:$0xff] %v4196_v38  ;;  %1776 = vst [vmem:[#allocation2 + $0x110] sm:$0xff] %v4200_v63  ;;  %v4629_v44 = vld [vmem:[#allocation32_spill] sm:$0xff]  ;;  %v4630_v57 = vld [vmem:[#allocation33_spill] sm:$0xff] }
 0x3a9   : > { %1777 = vst [vmem:[#allocation2 + $0x118] sm:$0xff] %v4202_v49  ;;  %1778 = vst [vmem:[#allocation2 + $0x98] sm:$0xff] %v4206_v52  ;;  %v4631_v59 = vld [vmem:[#allocation34_spill] sm:$0xff]  ;;  %v4632_v60 = vld [vmem:[#allocation35_spill] sm:$0xff] }
 0x3aa   : > { %1779 = vst [vmem:[#allocation2 + $0x120] sm:$0xff] %v4208_v13  ;;  %1780 = vst [vmem:[#allocation2 + $0x150] sm:$0xff] %v4210_v22  ;;  %v4633_v3 = vld [vmem:[#allocation36_spill] sm:$0xff]  ;;  %v4634_v47 = vld [vmem:[#allocation37_spill] sm:$0xff] }
 0x3ab   : > { %1781 = vst [vmem:[#allocation2 + $0x108] sm:$0xff] %v4212_v20  ;;  %1782 = vst [vmem:[#allocation2 + $0x60] sm:$0xff] %v4214_v29 }
 0x3ac   : > { %1783 = vst [vmem:[#allocation2 + $0xe0] sm:$0xff] %v4216_v35  ;;  %1784 = vst [vmem:[#allocation2 + $0x188] sm:$0xff] %v4218_v53 }
 0x3ad   : > { %1785 = vst [vmem:[#allocation2 + $0x138] sm:$0xff] %v4220_v55  ;;  %1786 = vst [vmem:[#allocation2 + $0x140] sm:$0xff] %v4222_v45 }
 0x3ae   : > { %1787 = vst [vmem:[#allocation2 + $0x80] sm:$0xff] %v4224_v4  ;;  %1788 = vst [vmem:[#allocation2 + $0x1a8] sm:$0xff] %v4226_v7 }
 0x3af   : > { %1789 = vst [vmem:[#allocation2 + $0x1b8] sm:$0xff] %v4228_v14  ;;  %1790 = vst [vmem:[#allocation2 + $0x28] sm:$0xff] %v4230_v16 }
 0x3b0   : > { %1791 = vst [vmem:[#allocation2 + $0x1e8] sm:$0xff] %v4232_v41  ;;  %1792 = vst [vmem:[#allocation2 + $0xf8] sm:$0xff] %v4234_v32 }
 0x3b1   : > { %1793 = vst [vmem:[#allocation2 + $0x160] sm:$0xff] %v4236_v43  ;;  %1794 = vst [vmem:[#allocation2 + $0x30] sm:$0xff] %v4238_v62 }
 0x3b2   : > { %1795 = vst [vmem:[#allocation2 + $0x1e0] sm:$0xff] %v4240_v46  ;;  %1796 = vst [vmem:[#allocation2] sm:$0xff] %v4242_v48 }
 0x3b3   : > { %1797 = vst [vmem:[#allocation2 + $0xf0] sm:$0xff] %v4244_v11  ;;  %1798 = vst [vmem:[#allocation2 + $0x8] sm:$0xff] %v4246_v21 }
 0x3b4   : > { %1799 = vst [vmem:[#allocation2 + $0x148] sm:$0xff] %v4248_v26  ;;  %1800 = vst [vmem:[#allocation2 + $0x1d0] sm:$0xff] %v4250_v34 }
 0x3b5   : > { %1801 = vst [vmem:[#allocation2 + $0x100] sm:$0xff] %v4252_v54  ;;  %1802 = vst [vmem:[#allocation2 + $0xc8] sm:$0xff] %v4254_v1 }
 0x3b6   : > { %1803 = vst [vmem:[#allocation2 + $0x40] sm:$0xff] %v4256_v51  ;;  %1804 = vst [vmem:[#allocation2 + $0x1f8] sm:$0xff] %v4258_v17 }
 0x3b7   : > { %1805 = vst [vmem:[#allocation2 + $0x20] sm:$0xff] %v4260_v25  ;;  %1806 = vst [vmem:[#allocation2 + $0x128] sm:$0xff] %v4262_v33 }
 0x3b8   : > { %1807 = vst [vmem:[#allocation2 + $0x1a0] sm:$0xff] %v4264_v58  ;;  %1808 = vst [vmem:[#allocation2 + $0x1f0] sm:$0xff] %v4266_v2 }
 0x3b9   : > { %1809 = vst [vmem:[#allocation2 + $0xe8] sm:$0xff] %v4268_v10  ;;  %1810 = vst [vmem:[#allocation2 + $0x78] sm:$0xff] %v4270_v24 }
 0x3ba   : > { %1811 = vst [vmem:[#allocation2 + $0x70] sm:$0xff] %v4272_v36  ;;  %1812 = vst [vmem:[#allocation2 + $0x90] sm:$0xff] %v4274_v56 }
 0x3bb   : > { %1813 = vst [vmem:[#allocation2 + $0x1d8] sm:$0xff] %v4621_v9  ;;  %1814 = vst [vmem:[#allocation2 + $0xd0] sm:$0xff] %v4622_v12 }
 0x3bc   : > { %1815 = vst [vmem:[#allocation2 + $0xb8] sm:$0xff] %v4623_v18  ;;  %1816 = vst [vmem:[#allocation2 + $0x88] sm:$0xff] %v4624_v15 }
 0x3bd   : > { %1817 = vst [vmem:[#allocation2 + $0xa8] sm:$0xff] %v4625_v27  ;;  %1818 = vst [vmem:[#allocation2 + $0x1c8] sm:$0xff] %v4626_v42 }
 0x3be   : > { %1819 = vst [vmem:[#allocation2 + $0x170] sm:$0xff] %v4627_v28  ;;  %1820 = vst [vmem:[#allocation2 + $0x178] sm:$0xff] %v4628_v31 }
 0x3bf   : > { %1821 = vst [vmem:[#allocation2 + $0x68] sm:$0xff] %v4629_v44  ;;  %1822 = vst [vmem:[#allocation2 + $0x190] sm:$0xff] %v4630_v57 }
 0x3c0   : > { %1823 = vst [vmem:[#allocation2 + $0x198] sm:$0xff] %v4631_v59  ;;  %1824 = vst [vmem:[#allocation2 + $0x38] sm:$0xff] %v4632_v60 }
 0x3c1   : > { %1825 = vst [vmem:[#allocation2 + $0xc0] sm:$0xff] %v4633_v3  ;;  %1826 = vst [vmem:[#allocation2 + $0x1c0] sm:$0xff] %v4634_v47 }
 0x3c2   : > { %1827 = vst [vmem:[#allocation2 + $0x158] sm:$0xff] %v4304_v39  ;;  %1828 = vst [vmem:[#allocation2 + $0x10] sm:$0xff] %v4306_v50 }
 0x3c3   : > { %1829 = vst [vmem:[#allocation2 + $0x58] sm:$0xff] %v4308_v6  ;;  %1830 = vst [vmem:[#allocation2 + $0xa0] sm:$0xff] %v4310_v40 }
 0x3c4 PF: > { %p2747_p5 = scmp.le.s32.totalorder %s3622_s12, 0 }
 0x3c6   : > { %1834 = sbr.rel (%p2747_p5) target bundleno = 1009 (0x3f1), region = 56 }
 0x3cb   : > { %v1835_v9 = vld [vmem:[#allocation2 + $0xb0] sm:$0xff]  ;;  %v1837_v18 = vld [vmem:[#allocation2 + $0xd8] sm:$0xff]  ;;  %v1840_v44 = vld [vmem:[#allocation2 + $0x168] sm:$0xff] }
 0x3cc   : > { %v1836_v12 = vld [vmem:[#allocation2 + $0x1b0] sm:$0xff]  ;;  %v1899_v15 = vadd.f32 %v1835_v9, %v4172_v37  ;;  %v1901_v42 = vadd.f32 %v1837_v18, %v4178_v0  ;;  %v1838_v28 = vld [vmem:[#allocation2 + $0x18] sm:$0xff]  ;;  %v1904_v60 = vadd.f32 %v1840_v44, %v4188_v23  ;;  %v1842_v47 = vld [vmem:[#allocation2 + $0x48] sm:$0xff] }
 0x3cd   : > { %v1900_v27 = vadd.f32 %v1836_v12, %v4176_v61  ;;  %v1839_v31 = vld [vmem:[#allocation2 + $0x50] sm:$0xff]  ;;  %v1902_v57 = vadd.f32 %v1838_v28, %v4182_v5  ;;  %v1843_v40 = vld [vmem:[#allocation2 + $0x180] sm:$0xff]  ;;  %v1906_v61 = vadd.f32 %v1842_v47, %v4194_v30  ;;  %v1845_v12 = vld [vmem:[#allocation2 + $0x118] sm:$0xff] }
 0x3ce   : > { %v1903_v59 = vadd.f32 %v1839_v31, %v4184_v8  ;;  %v1841_v3 = vld [vmem:[#allocation2 + $0x130] sm:$0xff]  ;;  %1963 = vst [vmem:[#allocation2 + $0xb0] sm:$0xff] %v1899_v15  ;;  %1965 = vst [vmem:[#allocation2 + $0xd8] sm:$0xff] %v1901_v42  ;;  %v1907_v0 = vadd.f32 %v1843_v40, %v4196_v38  ;;  %v1846_v18 = vld [vmem:[#allocation2 + $0x98] sm:$0xff]  ;;  %v1909_v8 = vadd.f32 %v1845_v12, %v4202_v49 }
 0x3cf   : > { %1964 = vst [vmem:[#allocation2 + $0x1b0] sm:$0xff] %v1900_v27  ;;  %v1905_v37 = vadd.f32 %v1841_v3, %v4190_v19  ;;  %v1844_v9 = vld [vmem:[#allocation2 + $0x110] sm:$0xff]  ;;  %1966 = vst [vmem:[#allocation2 + $0x18] sm:$0xff] %v1902_v57  ;;  %v1910_v23 = vadd.f32 %v1846_v18, %v4206_v52  ;;  %v1847_v15 = vld [vmem:[#allocation2 + $0x120] sm:$0xff] }
 0x3d0   : > { %1967 = vst [vmem:[#allocation2 + $0x50] sm:$0xff] %v1903_v59  ;;  %1968 = vst [vmem:[#allocation2 + $0x168] sm:$0xff] %v1904_v60  ;;  %v1908_v5 = vadd.f32 %v1844_v9, %v4200_v63  ;;  %v1848_v27 = vld [vmem:[#allocation2 + $0x150] sm:$0xff]  ;;  %v1849_v42 = vld [vmem:[#allocation2 + $0x108] sm:$0xff]  ;;  %v1911_v19 = vadd.f32 %v1847_v15, %v4208_v13 }
 0x3d1   : > { %1969 = vst [vmem:[#allocation2 + $0x130] sm:$0xff] %v1905_v37  ;;  %1970 = vst [vmem:[#allocation2 + $0x48] sm:$0xff] %v1906_v61  ;;  %v1912_v30 = vadd.f32 %v1848_v27, %v4210_v22  ;;  %v1913_v38 = vadd.f32 %v1849_v42, %v4212_v20  ;;  %v1850_v40 = vld [vmem:[#allocation2 + $0x60] sm:$0xff]  ;;  %v1852_v31 = vld [vmem:[#allocation2 + $0x188] sm:$0xff] }
 0x3d2   : > { %1971 = vst [vmem:[#allocation2 + $0x180] sm:$0xff] %v1907_v0  ;;  %v1851_v28 = vld [vmem:[#allocation2 + $0xe0] sm:$0xff]  ;;  %1972 = vst [vmem:[#allocation2 + $0x110] sm:$0xff] %v1908_v5  ;;  %v1914_v63 = vadd.f32 %v1850_v40, %v4214_v29  ;;  %v1916_v52 = vadd.f32 %v1852_v31, %v4218_v53  ;;  %v1853_v44 = vld [vmem:[#allocation2 + $0x138] sm:$0xff] }
 0x3d3   : > { %1973 = vst [vmem:[#allocation2 + $0x118] sm:$0xff] %v1909_v8  ;;  %1974 = vst [vmem:[#allocation2 + $0x98] sm:$0xff] %v1910_v23  ;;  %v1915_v49 = vadd.f32 %v1851_v28, %v4216_v35  ;;  %v1854_v57 = vld [vmem:[#allocation2 + $0x140] sm:$0xff]  ;;  %v1917_v13 = vadd.f32 %v1853_v44, %v4220_v55  ;;  %v1856_v60 = vld [vmem:[#allocation2 + $0x1a8] sm:$0xff] }
 0x3d4   : > { %v1855_v59 = vld [vmem:[#allocation2 + $0x80] sm:$0xff]  ;;  %1975 = vst [vmem:[#allocation2 + $0x120] sm:$0xff] %v1911_v19  ;;  %1976 = vst [vmem:[#allocation2 + $0x150] sm:$0xff] %v1912_v30  ;;  %v1918_v22 = vadd.f32 %v1854_v57, %v4222_v45  ;;  %v1857_v3 = vld [vmem:[#allocation2 + $0x1b8] sm:$0xff]  ;;  %v1920_v29 = vadd.f32 %v1856_v60, %v4226_v7 }
 0x3d5   : > { %1977 = vst [vmem:[#allocation2 + $0x108] sm:$0xff] %v1913_v38  ;;  %v1919_v20 = vadd.f32 %v1855_v59, %v4224_v4  ;;  %v1858_v47 = vld [vmem:[#allocation2 + $0x28] sm:$0xff]  ;;  %1978 = vst [vmem:[#allocation2 + $0x60] sm:$0xff] %v1914_v63  ;;  %v1921_v35 = vadd.f32 %v1857_v3, %v4228_v14  ;;  %v1860_v61 = vld [vmem:[#allocation2 + $0xf8] sm:$0xff] }
 0x3d6   : > { %1979 = vst [vmem:[#allocation2 + $0xe0] sm:$0xff] %v1915_v49  ;;  %1980 = vst [vmem:[#allocation2 + $0x188] sm:$0xff] %v1916_v52  ;;  %v1922_v53 = vadd.f32 %v1858_v47, %v4230_v16  ;;  %v1859_v37 = vld [vmem:[#allocation2 + $0x1e8] sm:$0xff]  ;;  %v1861_v0 = vld [vmem:[#allocation2 + $0x160] sm:$0xff]  ;;  %v1924_v45 = vadd.f32 %v1860_v61, %v4234_v32 }
 0x3d7   : > { %1981 = vst [vmem:[#allocation2 + $0x138] sm:$0xff] %v1917_v13  ;;  %1982 = vst [vmem:[#allocation2 + $0x140] sm:$0xff] %v1918_v22  ;;  %v1923_v55 = vadd.f32 %v1859_v37, %v4232_v41  ;;  %v1925_v4 = vadd.f32 %v1861_v0, %v4236_v43  ;;  %v1862_v9 = vld [vmem:[#allocation2 + $0x30] sm:$0xff]  ;;  %v1863_v12 = vld [vmem:[#allocation2 + $0x1e0] sm:$0xff] }
 0x3d8   : > { %1983 = vst [vmem:[#allocation2 + $0x80] sm:$0xff] %v1919_v20  ;;  %v1864_v18 = vld [vmem:[#allocation2] sm:$0xff]  ;;  %1984 = vst [vmem:[#allocation2 + $0x1a8] sm:$0xff] %v1920_v29  ;;  %v1926_v7 = vadd.f32 %v1862_v9, %v4238_v62  ;;  %v1927_v14 = vadd.f32 %v1863_v12, %v4240_v46  ;;  %v1865_v5 = vld [vmem:[#allocation2 + $0xf0] sm:$0xff] }
 0x3d9   : > { %1985 = vst [vmem:[#allocation2 + $0x1b8] sm:$0xff] %v1921_v35  ;;  %1986 = vst [vmem:[#allocation2 + $0x28] sm:$0xff] %v1922_v53  ;;  %v1928_v16 = vadd.f32 %v1864_v18, %v4242_v48  ;;  %v1866_v8 = vld [vmem:[#allocation2 + $0x8] sm:$0xff]  ;;  %v1929_v41 = vadd.f32 %v1865_v5, %v4244_v11  ;;  %v1868_v15 = vld [vmem:[#allocation2 + $0x1d0] sm:$0xff] }
 0x3da   : > { %v1867_v23 = vld [vmem:[#allocation2 + $0x148] sm:$0xff]  ;;  %1987 = vst [vmem:[#allocation2 + $0x1e8] sm:$0xff] %v1923_v55  ;;  %1988 = vst [vmem:[#allocation2 + $0xf8] sm:$0xff] %v1924_v45  ;;  %v1930_v32 = vadd.f32 %v1866_v8, %v4246_v21  ;;  %v1869_v27 = vld [vmem:[#allocation2 + $0x100] sm:$0xff]  ;;  %v1932_v62 = vadd.f32 %v1868_v15, %v4250_v34 }
 0x3db   : > { %1989 = vst [vmem:[#allocation2 + $0x160] sm:$0xff] %v1925_v4  ;;  %v1931_v43 = vadd.f32 %v1867_v23, %v4248_v26  ;;  %v1870_v42 = vld [vmem:[#allocation2 + $0xc8] sm:$0xff]  ;;  %1990 = vst [vmem:[#allocation2 + $0x30] sm:$0xff] %v1926_v7  ;;  %v1933_v46 = vadd.f32 %v1869_v27, %v4252_v54  ;;  %v1871_v19 = vld [vmem:[#allocation2 + $0x40] sm:$0xff] }
 0x3dc   : > { %1991 = vst [vmem:[#allocation2 + $0x1e0] sm:$0xff] %v1927_v14  ;;  %1992 = vst [vmem:[#allocation2] sm:$0xff] %v1928_v16  ;;  %v1934_v48 = vadd.f32 %v1870_v42, %v4254_v1  ;;  %v1872_v30 = vld [vmem:[#allocation2 + $0x1f8] sm:$0xff]  ;;  %v1873_v38 = vld [vmem:[#allocation2 + $0x20] sm:$0xff]  ;;  %v1935_v11 = vadd.f32 %v1871_v19, %v4256_v51 }
 0x3dd   : > { %1993 = vst [vmem:[#allocation2 + $0xf0] sm:$0xff] %v1929_v41  ;;  %1994 = vst [vmem:[#allocation2 + $0x8] sm:$0xff] %v1930_v32  ;;  %v1936_v21 = vadd.f32 %v1872_v30, %v4258_v17  ;;  %v1937_v26 = vadd.f32 %v1873_v38, %v4260_v25  ;;  %v1874_v40 = vld [vmem:[#allocation2 + $0x128] sm:$0xff]  ;;  %v1875_v28 = vld [vmem:[#allocation2 + $0x1a0] sm:$0xff] }
 0x3de   : > { %1995 = vst [vmem:[#allocation2 + $0x148] sm:$0xff] %v1931_v43  ;;  %v1876_v31 = vld [vmem:[#allocation2 + $0x1f0] sm:$0xff]  ;;  %1996 = vst [vmem:[#allocation2 + $0x1d0] sm:$0xff] %v1932_v62  ;;  %v1938_v34 = vadd.f32 %v1874_v40, %v4262_v33  ;;  %v1939_v54 = vadd.f32 %v1875_v28, %v4264_v58  ;;  %v1877_v63 = vld [vmem:[#allocation2 + $0xe8] sm:$0xff] }
 0x3df   : > { %1997 = vst [vmem:[#allocation2 + $0x100] sm:$0xff] %v1933_v46  ;;  %1998 = vst [vmem:[#allocation2 + $0xc8] sm:$0xff] %v1934_v48  ;;  %v1940_v1 = vadd.f32 %v1876_v31, %v4266_v2  ;;  %v1878_v49 = vld [vmem:[#allocation2 + $0x78] sm:$0xff]  ;;  %v1879_v52 = vld [vmem:[#allocation2 + $0x70] sm:$0xff]  ;;  %v1941_v51 = vadd.f32 %v1877_v63, %v4268_v10 }
 0x3e0   : > { %1999 = vst [vmem:[#allocation2 + $0x40] sm:$0xff] %v1935_v11  ;;  %2000 = vst [vmem:[#allocation2 + $0x1f8] sm:$0xff] %v1936_v21  ;;  %v1942_v17 = vadd.f32 %v1878_v49, %v4270_v24  ;;  %v1943_v25 = vadd.f32 %v1879_v52, %v4272_v36  ;;  %v1880_v44 = vld [vmem:[#allocation2 + $0x90] sm:$0xff]  ;;  %v1881_v57 = vld [vmem:[#allocation2 + $0x1d8] sm:$0xff] }
 0x3e1   : > { %2001 = vst [vmem:[#allocation2 + $0x20] sm:$0xff] %v1937_v26  ;;  %v1882_v59 = vld [vmem:[#allocation2 + $0xd0] sm:$0xff]  ;;  %2002 = vst [vmem:[#allocation2 + $0x128] sm:$0xff] %v1938_v34  ;;  %v1944_v33 = vadd.f32 %v1880_v44, %v4274_v56  ;;  %v4635_v58 = vld [vmem:[#allocation24_spill] sm:$0xff] }
 0x3e2   : > { %2003 = vst [vmem:[#allocation2 + $0x1a0] sm:$0xff] %v1939_v54  ;;  %2004 = vst [vmem:[#allocation2 + $0x1f0] sm:$0xff] %v1940_v1  ;;  %v1945_v2 = vadd.f32 %v1881_v57, %v4635_v58  ;;  %v4636_v13 = vld [vmem:[#allocation25_spill] sm:$0xff]  ;;  %v1883_v20 = vld [vmem:[#allocation2 + $0xb8] sm:$0xff] }
 0x3e3   : > { %v1946_v22 = vadd.f32 %v1882_v59, %v4636_v13  ;;  %v1884_v60 = vld [vmem:[#allocation2 + $0x88] sm:$0xff]  ;;  %2005 = vst [vmem:[#allocation2 + $0xe8] sm:$0xff] %v1941_v51  ;;  %2006 = vst [vmem:[#allocation2 + $0x78] sm:$0xff] %v1942_v17  ;;  %v4637_v10 = vld [vmem:[#allocation26_spill] sm:$0xff] }
 0x3e4   : > { %v1885_v3 = vld [vmem:[#allocation2 + $0xa8] sm:$0xff]  ;;  %2007 = vst [vmem:[#allocation2 + $0x70] sm:$0xff] %v1943_v25  ;;  %v1947_v24 = vadd.f32 %v1883_v20, %v4637_v10  ;;  %v4638_v36 = vld [vmem:[#allocation27_spill] sm:$0xff]  ;;  %v4639_v29 = vld [vmem:[#allocation28_spill] sm:$0xff] }
 0x3e5   : > { %v1948_v47 = vadd.f32 %v1884_v60, %v4638_v36  ;;  %v1949_v35 = vadd.f32 %v1885_v3, %v4639_v29  ;;  %v1886_v53 = vld [vmem:[#allocation2 + $0x1c8] sm:$0xff]  ;;  %v1887_v37 = vld [vmem:[#allocation2 + $0x170] sm:$0xff]  ;;  %v1888_v61 = vld [vmem:[#allocation2 + $0x178] sm:$0xff]  ;;  %2008 = vst [vmem:[#allocation2 + $0x90] sm:$0xff] %v1944_v33 }
 0x3e6   : > { %2009 = vst [vmem:[#allocation2 + $0x1d8] sm:$0xff] %v1945_v2  ;;  %2010 = vst [vmem:[#allocation2 + $0xd0] sm:$0xff] %v1946_v22  ;;  %v4640_v56 = vld [vmem:[#allocation29_spill] sm:$0xff]  ;;  %v4641_v55 = vld [vmem:[#allocation30_spill] sm:$0xff] }
 0x3e7   : > { %v1950_v0 = vadd.f32 %v1886_v53, %v4640_v56  ;;  %v1951_v45 = vadd.f32 %v1887_v37, %v4641_v55  ;;  %v4642_v4 = vld [vmem:[#allocation31_spill] sm:$0xff]  ;;  %v1889_v12 = vld [vmem:[#allocation2 + $0x68] sm:$0xff]  ;;  %v1890_v18 = vld [vmem:[#allocation2 + $0x190] sm:$0xff]  ;;  %2011 = vst [vmem:[#allocation2 + $0xb8] sm:$0xff] %v1947_v24 }
 0x3e8   : > { %v1952_v9 = vadd.f32 %v1888_v61, %v4642_v4  ;;  %v1891_v7 = vld [vmem:[#allocation2 + $0x198] sm:$0xff]  ;;  %2012 = vst [vmem:[#allocation2 + $0x88] sm:$0xff] %v1948_v47  ;;  %2013 = vst [vmem:[#allocation2 + $0xa8] sm:$0xff] %v1949_v35  ;;  %v4643_v14 = vld [vmem:[#allocation32_spill] sm:$0xff] }
 0x3e9   : > { %v1953_v16 = vadd.f32 %v1889_v12, %v4643_v14  ;;  %v4644_v5 = vld [vmem:[#allocation33_spill] sm:$0xff]  ;;  %v4645_v23 = vld [vmem:[#allocation34_spill] sm:$0xff]  ;;  %v1892_v32 = vld [vmem:[#allocation2 + $0x38] sm:$0xff]  ;;  %2014 = vst [vmem:[#allocation2 + $0x1c8] sm:$0xff] %v1950_v0 }
 0x3ea   : > { %v1954_v8 = vadd.f32 %v1890_v18, %v4644_v5  ;;  %v1955_v41 = vadd.f32 %v1891_v7, %v4645_v23  ;;  %v1893_v43 = vld [vmem:[#allocation2 + $0xc0] sm:$0xff]  ;;  %2015 = vst [vmem:[#allocation2 + $0x170] sm:$0xff] %v1951_v45  ;;  %2016 = vst [vmem:[#allocation2 + $0x178] sm:$0xff] %v1952_v9  ;;  %v4646_v27 = vld [vmem:[#allocation35_spill] sm:$0xff] }
 0x3eb   : > { %v1894_v15 = vld [vmem:[#allocation2 + $0x1c0] sm:$0xff]  ;;  %v1956_v42 = vadd.f32 %v1892_v32, %v4646_v27  ;;  %v4648_v48 = vld [vmem:[#allocation37_spill] sm:$0xff]  ;;  %v1895_v30 = vld [vmem:[#allocation2 + $0x158] sm:$0xff]  ;;  %2017 = vst [vmem:[#allocation2 + $0x68] sm:$0xff] %v1953_v16 }
 0x3ec   : > { %v4647_v62 = vld [vmem:[#allocation36_spill] sm:$0xff]  ;;  %v1958_v19 = vadd.f32 %v1894_v15, %v4648_v48  ;;  %v1896_v38 = vld [vmem:[#allocation2 + $0x10] sm:$0xff]  ;;  %v1897_v11 = vld [vmem:[#allocation2 + $0x58] sm:$0xff]  ;;  %2018 = vst [vmem:[#allocation2 + $0x190] sm:$0xff] %v1954_v8  ;;  %v1959_v21 = vadd.f32 %v1895_v30, %v4304_v39 }
 0x3ed   : > { %v1957_v46 = vadd.f32 %v1893_v43, %v4647_v62  ;;  %2019 = vst [vmem:[#allocation2 + $0x198] sm:$0xff] %v1955_v41  ;;  %v1960_v26 = vadd.f32 %v1896_v38, %v4306_v50  ;;  %v1961_v40 = vadd.f32 %v1897_v11, %v4308_v6  ;;  %v1898_v28 = vld [vmem:[#allocation2 + $0xa0] sm:$0xff]  ;;  %2020 = vst [vmem:[#allocation2 + $0x38] sm:$0xff] %v1956_v42  ;;  %v4649_v31 = vld [vmem:[#allocation38_spill] sm:$0xff] }
 0x3ee   : > { %2022 = vst [vmem:[#allocation2 + $0x1c0] sm:$0xff] %v1958_v19  ;;  %v1962_v34 = vadd.f32 %v1898_v28, %v4649_v31  ;;  %2023 = vst [vmem:[#allocation2 + $0x158] sm:$0xff] %v1959_v21 }
 0x3ef   : > { %2021 = vst [vmem:[#allocation2 + $0xc0] sm:$0xff] %v1957_v46  ;;  %2024 = vst [vmem:[#allocation2 + $0x10] sm:$0xff] %v1960_v26 }
 0x3f0   : > { %2025 = vst [vmem:[#allocation2 + $0x58] sm:$0xff] %v1961_v40  ;;  %2026 = vst [vmem:[#allocation2 + $0xa0] sm:$0xff] %v1962_v34 }
 0x3f1 PF: > { %p2748_p0 = scmp.ne.s32.totalorder %s3622_s12, 1 }
 0x3f2   : > { %s4650_s6 = sld [smem:[#allocation41_spill]] (!%p2748_p0) }
 0x3f3   : > { %2030 = sbr.rel (%p2748_p0) target bundleno = 1062 (0x426), region = 60 }
 0x3f8   : > { %v2031_v54 = vld [vmem:[#allocation2 + $0xb0] sm:$0xff]  ;;  %v4446_v6 = vld [vmem:[%s4650_s6] ss:$0 sm:$0xff]  ;;  %v2033_v63 = vld [vmem:[#allocation2 + $0xd8] sm:$0xff] }
 0x3f9   : > { %v2032_v39 = vld [vmem:[#allocation2 + $0x1b0] sm:$0xff]  ;;  %v2102_v50 = vadd.f32 %v4446_v6, %v2031_v54  ;;  %v2034_v49 = vld [vmem:[#allocation2 + $0x18] sm:$0xff]  ;;  %v2104_v51 = vadd.f32 %v4446_v6, %v2033_v63  ;;  %v2036_v25 = vld [vmem:[#allocation2 + $0x168] sm:$0xff] }
 0x3fa   : > { %v2103_v1 = vadd.f32 %v4446_v6, %v2032_v39  ;;  %v2035_v52 = vld [vmem:[#allocation2 + $0x50] sm:$0xff]  ;;  %v2105_v17 = vadd.f32 %v4446_v6, %v2034_v49  ;;  %v2038_v59 = vld [vmem:[#allocation2 + $0x48] sm:$0xff]  ;;  %v2107_v2 = vadd.f32 %v4446_v6, %v2036_v25  ;;  %v2039_v22 = vld [vmem:[#allocation2 + $0x180] sm:$0xff] }
 0x3fb   : > { %v2106_v44 = vadd.f32 %v4446_v6, %v2035_v52  ;;  %v2037_v57 = vld [vmem:[#allocation2 + $0x130] sm:$0xff]  ;;  %v2166_v33 = vmax.f32 %v2102_v50, 0.0  ;;  %v2041_v60 = vld [vmem:[#allocation2 + $0x118] sm:$0xff]  ;;  %v2168_v3 = vmax.f32 %v2104_v51, 0.0  ;;  %v2109_v36 = vadd.f32 %v4446_v6, %v2038_v59  ;;  %v2043_v29 = vld [vmem:[#allocation2 + $0x120] sm:$0xff] }
 0x3fc   : > { %v2167_v58 = vmax.f32 %v2103_v1, 0.0  ;;  %v2108_v13 = vadd.f32 %v4446_v6, %v2037_v57  ;;  %v2040_v20 = vld [vmem:[#allocation2 + $0x110] sm:$0xff]  ;;  %v2169_v10 = vmax.f32 %v2105_v17, 0.0  ;;  %v2042_v47 = vld [vmem:[#allocation2 + $0x98] sm:$0xff]  ;;  %v2171_v53 = vmax.f32 %v2107_v2, 0.0  ;;  %v2045_v9 = vld [vmem:[#allocation2 + $0x108] sm:$0xff] }
 0x3fd   : > { %v2170_v24 = vmax.f32 %v2106_v44, 0.0  ;;  %v2110_v61 = vadd.f32 %v4446_v6, %v2039_v22  ;;  %v2044_v56 = vld [vmem:[#allocation2 + $0x150] sm:$0xff]  ;;  %v2173_v55 = vmax.f32 %v2109_v36, 0.0  ;;  %v2111_v45 = vadd.f32 %v4446_v6, %v2040_v20  ;;  %v2046_v12 = vld [vmem:[#allocation2 + $0x60] sm:$0xff]  ;;  %v2048_v8 = vld [vmem:[#allocation2 + $0x188] sm:$0xff] }
 0x3fe   : > { %v2888_v35 = vpack.c.bf16 %v2167_v58, %v2166_v33  ;;  %v2172_v37 = vmax.f32 %v2108_v13, 0.0  ;;  %v2893_v0 = vpack.c.bf16 %v2169_v10, %v2168_v3  ;;  %v2112_v4 = vadd.f32 %v4446_v6, %v2041_v60  ;;  %v2047_v5 = vld [vmem:[#allocation2 + $0xe0] sm:$0xff]  ;;  %v2049_v15 = vld [vmem:[#allocation2 + $0x138] sm:$0xff]  ;;  %v2052_v26 = vld [vmem:[#allocation2 + $0x1a8] sm:$0xff] }
 0x3ff   : > { %v2898_v18 = vpack.c.bf16 %v2171_v53, %v2170_v24  ;;  %v2174_v7 = vmax.f32 %v2110_v61, 0.0  ;;  %v2113_v14 = vadd.f32 %v4446_v6, %v2042_v47  ;;  %v2114_v16 = vadd.f32 %v4446_v6, %v2043_v29  ;;  %v2050_v48 = vld [vmem:[#allocation2 + $0x140] sm:$0xff]  ;;  %v2053_v54 = vld [vmem:[#allocation2 + $0x1b8] sm:$0xff]  ;;  %v2054_v39 = vld [vmem:[#allocation2 + $0x28] sm:$0xff] }
 0x400   : > { %2889 = vst [vmem:[#allocation12] sm:$0xff] %v2888_v35   ;;  %3045 = vst [vmem:[#allocation12 + $0x8] sm:$0xff] %v2893_v0   ;;  %v2903_v23 = vpack.c.bf16 %v2173_v55, %v2172_v37  ;;  %v2175_v41 = vmax.f32 %v2111_v45, 0.0  ;;  %v2176_v32 = vmax.f32 %v2112_v4, 0.0  ;;  %v2115_v43 = vadd.f32 %v4446_v6, %v2044_v56  ;;  %v2051_v21 = vld [vmem:[#allocation2 + $0x80] sm:$0xff]  ;;  %v2055_v52 = vld [vmem:[#allocation2 + $0x1e8] sm:$0xff] }
 0x401   : > { %3046 = vst [vmem:[#allocation12 + $0x10] sm:$0xff] %v2898_v18   ;;  %v2177_v27 = vmax.f32 %v2113_v14, 0.0  ;;  %v2178_v42 = vmax.f32 %v2114_v16, 0.0  ;;  %v2116_v62 = vadd.f32 %v4446_v6, %v2045_v9  ;;  %v2117_v46 = vadd.f32 %v4446_v6, %v2046_v12  ;;  %v2056_v51 = vld [vmem:[#allocation2 + $0xf8] sm:$0xff]  ;;  %v2057_v59 = vld [vmem:[#allocation2 + $0x160] sm:$0xff]  ;;  %v2058_v22 = vld [vmem:[#allocation2 + $0x30] sm:$0xff] }
 0x402   : > { %3047 = vst [vmem:[#allocation12 + $0x18] sm:$0xff] %v2903_v23   ;;  %v2908_v19 = vpack.c.bf16 %v2175_v41, %v2174_v7  ;;  %v2179_v30 = vmax.f32 %v2115_v43, 0.0  ;;  %v2118_v38 = vadd.f32 %v4446_v6, %v2047_v5  ;;  %v2119_v11 = vadd.f32 %v4446_v6, %v2048_v8  ;;  %v2059_v24 = vld [vmem:[#allocation2 + $0x1e0] sm:$0xff]  ;;  %v2061_v37 = vld [vmem:[#allocation2 + $0xf0] sm:$0xff]  ;;  %v2062_v61 = vld [vmem:[#allocation2 + $0x8] sm:$0xff] }
 0x403   : > { %v2913_v40 = vpack.c.bf16 %v2177_v27, %v2176_v32  ;;  %v2180_v28 = vmax.f32 %v2116_v62, 0.0  ;;  %v2181_v31 = vmax.f32 %v2117_v46, 0.0  ;;  %v2120_v34 = vadd.f32 %v4446_v6, %v2049_v15  ;;  %v2060_v36 = vld [vmem:[#allocation2] sm:$0xff]  ;;  %v2063_v4 = vld [vmem:[#allocation2 + $0x148] sm:$0xff]  ;;  %v2064_v9 = vld [vmem:[#allocation2 + $0x1d0] sm:$0xff] }
 0x404   : > { %3048 = vst [vmem:[#allocation12 + $0x20] sm:$0xff] %v2908_v19   ;;  %v2918_v50 = vpack.c.bf16 %v2179_v30, %v2178_v42  ;;  %v2182_v1 = vmax.f32 %v2118_v38, 0.0  ;;  %v2183_v63 = vmax.f32 %v2119_v11, 0.0  ;;  %v2121_v49 = vadd.f32 %v4446_v6, %v2050_v48  ;;  %v2065_v16 = vld [vmem:[#allocation2 + $0x100] sm:$0xff]  ;;  %v2066_v32 = vld [vmem:[#allocation2 + $0xc8] sm:$0xff]  ;;  %v2068_v46 = vld [vmem:[#allocation2 + $0x1f8] sm:$0xff] }
 0x405   : > { %3049 = vst [vmem:[#allocation12 + $0x28] sm:$0xff] %v2913_v40   ;;  %v2923_v17 = vpack.c.bf16 %v2181_v31, %v2180_v28  ;;  %v2184_v25 = vmax.f32 %v2120_v34, 0.0  ;;  %v2122_v44 = vadd.f32 %v4446_v6, %v2051_v21  ;;  %v2123_v57 = vadd.f32 %v4446_v6, %v2052_v26  ;;  %v2067_v62 = vld [vmem:[#allocation2 + $0x40] sm:$0xff]  ;;  %v2070_v21 = vld [vmem:[#allocation2 + $0x128] sm:$0xff] }
 0x406   : > { %3050 = vst [vmem:[#allocation12 + $0x30] sm:$0xff] %v2918_v50   ;;  %v2928_v33 = vpack.c.bf16 %v2183_v63, %v2182_v1  ;;  %v2185_v58 = vmax.f32 %v2121_v49, 0.0  ;;  %v2124_v2 = vadd.f32 %v4446_v6, %v2053_v54  ;;  %v2125_v13 = vadd.f32 %v4446_v6, %v2054_v39  ;;  %v2069_v11 = vld [vmem:[#allocation2 + $0x20] sm:$0xff]  ;;  %v2072_v54 = vld [vmem:[#allocation2 + $0x1f0] sm:$0xff]  ;;  %v2073_v49 = vld [vmem:[#allocation2 + $0xe8] sm:$0xff] }
 0x407   : > { %3051 = vst [vmem:[#allocation12 + $0x38] sm:$0xff] %v2923_v17   ;;  %v2186_v20 = vmax.f32 %v2122_v44, 0.0  ;;  %v2187_v60 = vmax.f32 %v2123_v57, 0.0  ;;  %v2126_v3 = vadd.f32 %v4446_v6, %v2055_v52  ;;  %v2127_v10 = vadd.f32 %v4446_v6, %v2056_v51  ;;  %v2071_v34 = vld [vmem:[#allocation2 + $0x1a0] sm:$0xff]  ;;  %v2074_v44 = vld [vmem:[#allocation2 + $0x78] sm:$0xff] }
 0x408   : > { %3052 = vst [vmem:[#allocation12 + $0x40] sm:$0xff] %v2928_v33   ;;  %v2933_v47 = vpack.c.bf16 %v2185_v58, %v2184_v25  ;;  %v2188_v29 = vmax.f32 %v2124_v2, 0.0  ;;  %v2189_v35 = vmax.f32 %v2125_v13, 0.0  ;;  %v2128_v53 = vadd.f32 %v4446_v6, %v2057_v59  ;;  %v2075_v2 = vld [vmem:[#allocation2 + $0x70] sm:$0xff] }
 0x409   : > { %v2938_v56 = vpack.c.bf16 %v2187_v60, %v2186_v20  ;;  %v2190_v0 = vmax.f32 %v2126_v3, 0.0  ;;  %v2191_v55 = vmax.f32 %v2127_v10, 0.0  ;;  %v2129_v45 = vadd.f32 %v4446_v6, %v2058_v22  ;;  %v2076_v13 = vld [vmem:[#allocation2 + $0x90] sm:$0xff]  ;;  %v2077_v10 = vld [vmem:[#allocation2 + $0x1d8] sm:$0xff] }
 0x40a   : > { %3053 = vst [vmem:[#allocation12 + $0x48] sm:$0xff] %v2933_v47   ;;  %v2943_v12 = vpack.c.bf16 %v2189_v35, %v2188_v29  ;;  %v2192_v18 = vmax.f32 %v2128_v53, 0.0  ;;  %v2130_v7 = vadd.f32 %v4446_v6, %v2059_v24  ;;  %v2131_v14 = vadd.f32 %v4446_v6, %v2060_v36  ;;  %v2078_v24 = vld [vmem:[#allocation2 + $0xd0] sm:$0xff]  ;;  %v2079_v53 = vld [vmem:[#allocation2 + $0xb8] sm:$0xff] }
 0x40b   : > { %3054 = vst [vmem:[#allocation12 + $0x50] sm:$0xff] %v2938_v56   ;;  %v2948_v5 = vpack.c.bf16 %v2191_v55, %v2190_v0  ;;  %v2193_v8 = vmax.f32 %v2129_v45, 0.0  ;;  %v2132_v23 = vadd.f32 %v4446_v6, %v2061_v37  ;;  %v2133_v41 = vadd.f32 %v4446_v6, %v2062_v61  ;;  %v2080_v37 = vld [vmem:[#allocation2 + $0x88] sm:$0xff] }
 0x40c   : > { %3055 = vst [vmem:[#allocation12 + $0x58] sm:$0xff] %v2943_v12   ;;  %v2194_v43 = vmax.f32 %v2130_v7, 0.0  ;;  %v2195_v15 = vmax.f32 %v2131_v14, 0.0  ;;  %v2134_v27 = vadd.f32 %v4446_v6, %v2063_v4  ;;  %v2135_v42 = vadd.f32 %v4446_v6, %v2064_v9  ;;  %v2081_v45 = vld [vmem:[#allocation2 + $0xa8] sm:$0xff] }
 0x40d   : > { %3056 = vst [vmem:[#allocation12 + $0x60] sm:$0xff] %v2948_v5   ;;  %v2953_v48 = vpack.c.bf16 %v2193_v8, %v2192_v18  ;;  %v2196_v19 = vmax.f32 %v2132_v23, 0.0  ;;  %v2197_v30 = vmax.f32 %v2133_v41, 0.0  ;;  %v2136_v38 = vadd.f32 %v4446_v6, %v2065_v16  ;;  %v2082_v7 = vld [vmem:[#allocation2 + $0x1c8] sm:$0xff]  ;;  %v2083_v23 = vld [vmem:[#allocation2 + $0x170] sm:$0xff]  ;;  %v2084_v41 = vld [vmem:[#allocation2 + $0x178] sm:$0xff] }
 0x40e   : > { %v2958_v26 = vpack.c.bf16 %v2195_v15, %v2194_v43  ;;  %v2198_v40 = vmax.f32 %v2134_v27, 0.0  ;;  %v2199_v28 = vmax.f32 %v2135_v42, 0.0  ;;  %v2137_v31 = vadd.f32 %v4446_v6, %v2066_v32  ;;  %v2085_v42 = vld [vmem:[#allocation2 + $0x68] sm:$0xff] }
 0x40f   : > { %3057 = vst [vmem:[#allocation12 + $0x68] sm:$0xff] %v2953_v48   ;;  %v2963_v39 = vpack.c.bf16 %v2197_v30, %v2196_v19  ;;  %v2200_v50 = vmax.f32 %v2136_v38, 0.0  ;;  %v2138_v1 = vadd.f32 %v4446_v6, %v2067_v62  ;;  %v2139_v63 = vadd.f32 %v4446_v6, %v2068_v46  ;;  %v2086_v62 = vld [vmem:[#allocation2 + $0x190] sm:$0xff]  ;;  %v2087_v38 = vld [vmem:[#allocation2 + $0x198] sm:$0xff] }
 0x410   : > { %3058 = vst [vmem:[#allocation12 + $0x70] sm:$0xff] %v2958_v26   ;;  %v2968_v52 = vpack.c.bf16 %v2199_v28, %v2198_v40  ;;  %v2201_v51 = vmax.f32 %v2137_v31, 0.0  ;;  %v2140_v17 = vadd.f32 %v4446_v6, %v2069_v11  ;;  %v2141_v25 = vadd.f32 %v4446_v6, %v2070_v21  ;;  %v2088_v11 = vld [vmem:[#allocation2 + $0x38] sm:$0xff]  ;;  %v2089_v31 = vld [vmem:[#allocation2 + $0xc0] sm:$0xff] }
 0x411   : > { %3059 = vst [vmem:[#allocation12 + $0x78] sm:$0xff] %v2963_v39   ;;  %v2202_v57 = vmax.f32 %v2138_v1, 0.0  ;;  %v2203_v59 = vmax.f32 %v2139_v63, 0.0  ;;  %v2142_v33 = vadd.f32 %v4446_v6, %v2071_v34  ;;  %v2143_v58 = vadd.f32 %v4446_v6, %v2072_v54  ;;  %v2090_v1 = vld [vmem:[#allocation2 + $0x1c0] sm:$0xff] }
 0x412   : > { %3060 = vst [vmem:[#allocation12 + $0x80] sm:$0xff] %v2968_v52   ;;  %v2973_v22 = vpack.c.bf16 %v2201_v51, %v2200_v50  ;;  %v2204_v20 = vmax.f32 %v2140_v17, 0.0  ;;  %v2205_v60 = vmax.f32 %v2141_v25, 0.0  ;;  %v2144_v3 = vadd.f32 %v4446_v6, %v2073_v49  ;;  %v2091_v17 = vld [vmem:[#allocation2 + $0x158] sm:$0xff]  ;;  %v2092_v25 = vld [vmem:[#allocation2 + $0x10] sm:$0xff] }
 0x413   : > { %v2978_v36 = vpack.c.bf16 %v2203_v59, %v2202_v57  ;;  %v2206_v47 = vmax.f32 %v2142_v33, 0.0  ;;  %v2207_v29 = vmax.f32 %v2143_v58, 0.0  ;;  %v2145_v35 = vadd.f32 %v4446_v6, %v2074_v44  ;;  %v2093_v58 = vld [vmem:[#allocation2 + $0x58] sm:$0xff] }
 0x414   : > { %3061 = vst [vmem:[#allocation12 + $0x88] sm:$0xff] %v2973_v22   ;;  %v2983_v61 = vpack.c.bf16 %v2205_v60, %v2204_v20  ;;  %v2208_v56 = vmax.f32 %v2144_v3, 0.0  ;;  %v2146_v0 = vadd.f32 %v4446_v6, %v2075_v2  ;;  %v2147_v55 = vadd.f32 %v4446_v6, %v2076_v13  ;;  %v2094_v2 = vld [vmem:[#allocation2 + $0xa0] sm:$0xff] }
 0x415   : > { %3062 = vst [vmem:[#allocation12 + $0x90] sm:$0xff] %v2978_v36   ;;  %v2988_v4 = vpack.c.bf16 %v2207_v29, %v2206_v47  ;;  %v2209_v9 = vmax.f32 %v2145_v35, 0.0  ;;  %v2148_v12 = vadd.f32 %v4446_v6, %v2077_v10  ;;  %v2149_v18 = vadd.f32 %v4446_v6, %v2078_v24 }
 0x416   : > { %3063 = vst [vmem:[#allocation12 + $0x98] sm:$0xff] %v2983_v61   ;;  %v2210_v14 = vmax.f32 %v2146_v0, 0.0  ;;  %v2211_v16 = vmax.f32 %v2147_v55, 0.0  ;;  %v2150_v5 = vadd.f32 %v4446_v6, %v2079_v53  ;;  %v2151_v8 = vadd.f32 %v4446_v6, %v2080_v37 }
 0x417   : > { %3064 = vst [vmem:[#allocation12 + $0xa0] sm:$0xff] %v2988_v4   ;;  %v2993_v32 = vpack.c.bf16 %v2209_v9, %v2208_v56  ;;  %v2212_v43 = vmax.f32 %v2148_v12, 0.0  ;;  %v2213_v15 = vmax.f32 %v2149_v18, 0.0  ;;  %v2152_v27 = vadd.f32 %v4446_v6, %v2081_v45 }
 0x418   : > { %v2998_v46 = vpack.c.bf16 %v2211_v16, %v2210_v14  ;;  %v2214_v48 = vmax.f32 %v2150_v5, 0.0  ;;  %v2215_v19 = vmax.f32 %v2151_v8, 0.0  ;;  %v2153_v30 = vadd.f32 %v4446_v6, %v2082_v7 }
 0x419   : > { %3065 = vst [vmem:[#allocation12 + $0xa8] sm:$0xff] %v2993_v32   ;;  %v3003_v21 = vpack.c.bf16 %v2213_v15, %v2212_v43  ;;  %v2216_v26 = vmax.f32 %v2152_v27, 0.0  ;;  %v2154_v40 = vadd.f32 %v4446_v6, %v2083_v23  ;;  %v2155_v28 = vadd.f32 %v4446_v6, %v2084_v41 }
 0x41a   : > { %3066 = vst [vmem:[#allocation12 + $0xb0] sm:$0xff] %v2998_v46   ;;  %v3008_v34 = vpack.c.bf16 %v2215_v19, %v2214_v48  ;;  %v2217_v54 = vmax.f32 %v2153_v30, 0.0  ;;  %v2156_v39 = vadd.f32 %v4446_v6, %v2085_v42  ;;  %v2157_v50 = vadd.f32 %v4446_v6, %v2086_v62 }
 0x41b   : > { %3067 = vst [vmem:[#allocation12 + $0xb8] sm:$0xff] %v3003_v21   ;;  %v2218_v63 = vmax.f32 %v2154_v40, 0.0  ;;  %v2219_v49 = vmax.f32 %v2155_v28, 0.0  ;;  %v2158_v52 = vadd.f32 %v4446_v6, %v2087_v38  ;;  %v2159_v51 = vadd.f32 %v4446_v6, %v2088_v11 }
 0x41c   : > { %3068 = vst [vmem:[#allocation12 + $0xc0] sm:$0xff] %v3008_v34   ;;  %v3013_v44 = vpack.c.bf16 %v2217_v54, %v2216_v26  ;;  %v2220_v57 = vmax.f32 %v2156_v39, 0.0  ;;  %v2221_v59 = vmax.f32 %v2157_v50, 0.0  ;;  %v2160_v33 = vadd.f32 %v4446_v6, %v2089_v31 }
 0x41d   : > { %v3018_v13 = vpack.c.bf16 %v2219_v49, %v2218_v63  ;;  %v2222_v22 = vmax.f32 %v2158_v52, 0.0  ;;  %v2223_v20 = vmax.f32 %v2159_v51, 0.0  ;;  %v2161_v60 = vadd.f32 %v4446_v6, %v2090_v1 }
 0x41e   : > { %3069 = vst [vmem:[#allocation12 + $0xc8] sm:$0xff] %v3013_v44   ;;  %v3023_v3 = vpack.c.bf16 %v2221_v59, %v2220_v57  ;;  %v2224_v10 = vmax.f32 %v2160_v33, 0.0  ;;  %v2162_v24 = vadd.f32 %v4446_v6, %v2091_v17  ;;  %v2163_v36 = vadd.f32 %v4446_v6, %v2092_v25 }
 0x41f   : > { %3070 = vst [vmem:[#allocation12 + $0xd0] sm:$0xff] %v3018_v13   ;;  %v3028_v47 = vpack.c.bf16 %v2223_v20, %v2222_v22  ;;  %v2225_v29 = vmax.f32 %v2161_v60, 0.0  ;;  %v2164_v35 = vadd.f32 %v4446_v6, %v2093_v58  ;;  %v2165_v53 = vadd.f32 %v4446_v6, %v2094_v2 }
 0x420   : > { %3071 = vst [vmem:[#allocation12 + $0xd8] sm:$0xff] %v3023_v3   ;;  %v2226_v37 = vmax.f32 %v2162_v24, 0.0  ;;  %v2227_v61 = vmax.f32 %v2163_v36, 0.0 }
 0x421   : > { %3072 = vst [vmem:[#allocation12 + $0xe0] sm:$0xff] %v3028_v47   ;;  %v3033_v56 = vpack.c.bf16 %v2225_v29, %v2224_v10  ;;  %v2228_v0 = vmax.f32 %v2164_v35, 0.0  ;;  %v2229_v55 = vmax.f32 %v2165_v53, 0.0 }
 0x422   : > { %v3038_v45 = vpack.c.bf16 %v2227_v61, %v2226_v37 }
 0x423   : > { %3073 = vst [vmem:[#allocation12 + $0xe8] sm:$0xff] %v3033_v56   ;;  %v3043_v4 = vpack.c.bf16 %v2229_v55, %v2228_v0 }
 0x424   : > { %3074 = vst [vmem:[#allocation12 + $0xf0] sm:$0xff] %v3038_v45  }
 0x425   : > { %3075 = vst [vmem:[#allocation12 + $0xf8] sm:$0xff] %v3043_v4  }
 0x426 PF: > { %p3241_p1 = scmp.eq.s32.totalorder %s3746_s15, 1  ;;  %s3643_s12 = smov [#allocation12]  }
 0x427   : > { %s2560_s22 = sshll.u32 %s3643_s12, 4  ;;  %s2561_s22 = int_to_ptr.vmem [resolvable:$true] %s2560_s22 }
 0x428   : > { %s3494_s27 = scalar_lea.vmem %s2561_s22, 4096  ;;  %p3501_p6 = scmp.lt.s32.totalorder %s2561_s22, %s2561_s22 }
 0x429   : > { %p3495_p2 = scmp.ne.s32.totalorder %s2561_s22, %s3494_s27  ;;  %p3502_p7 = scmp.lt.s32.totalorder %s3494_s27, %s3494_s27 }
 0x42b   : > { %p3496_p4 = pnand %p3495_p2, %p3241_p1  ;;  %p3503_p12 = por %p3502_p7, %p3501_p6 }
 0x42d   : > { %p3497_p8 = pneg %p3496_p4 }
 0x42f   : > { %p3504_p11 = pnand %p3503_p12, %p3497_p8 }
 0x431   : > { %3507 = shalt.err (!%p3504_p11)
}
 0x432   : > { %s3644_s25 = smov 64   ;;  %s3645_s2 = smov 4  }
 0x433   : > { %s4651_s23 = sld [smem:[#allocation42_spill]] }
 0x439   : > { %3223 = dma.vmem_to_hbm [thread:$0]  (%p3241_p1), %s2561_s22, 4096, %s4651_s23, [#allocation8], %s3644_s25, %s3644_s25, %s3645_s2  }
 0x43a   : > { %3581 = dma.done.wait (%p3241_p1), [#allocation8], 4096  }
 0x43b   : > { %3583 = vsyncadd (%p3241_p1), [#allocation8], 4294963200 }
 0x43c PF: > { %s31_s14 = sadd.s32 1, %s3630_s14   ;;  %s4652_s28 = smov %s3890_s0 }
 0x43d   : > { %p28_p9 = scmp.ge.s32.totalorder %s31_s14, 4   ;;  %s4653_s20 = sld [smem:[#allocation22_spill]] }
 0x43e   : > { %s4654_s8 = sld [smem:[#allocation23_spill]]  ;;  %s4655_s0 = smov %s3590_s1 }
 0x43f   : > { %s4656_s1 = smov %s3594_s29  ;;  %s4657_s29 = smov %s4652_s28 }
 0x440   : > { %s4658_s30 = smov %s3602_s7  ;;  %s4660_s9 = smov %s3614_s10 }
 0x441   : > { %s4661_s10 = smov %s3618_s11  ;;  %s4662_s11 = smov %s3842_s5 }
 0x442   : > { %s4663_s12 = smov %s3626_s13  ;;  %s4664_s13 = smov %s4666_s16 }
 0x443   : > { %s4659_s7 = smov %s4653_s20  ;;  %30 = sbr.rel (!%p28_p9) target bundleno = 28 (0x1c), region = 113 }
 0x448   :  { %2576 = vsyncpa [#allocation7], 1 }
 0x449   :  { %2578 = vsyncpa [#allocation7 + $0x1], 1 }
 0x44a   :  { %2579 = vsyncpa [#allocation10], 1 }
 0x44b   :  { %2581 = vsyncpa [#allocation10 + $0x1], 1 }
 0x44c   :  { %2582 = vsyncpa [#allocation8], 1 }
 0x44d   :  { %2584 = vsyncpa [#allocation8 + $0x1], 1 }

</bundles_post_ra>
